<compile_context>
chip_gen: v6e
topology: v6e:2x2x1
jax: 0.10.0
libtpu: 0.0.40
codegen_flags: <defaults>
</compile_context>

<pallas_src>
import functools

import jax
import jax.numpy as jnp
from jax.experimental import pallas as pl
from jax.experimental.pallas import tpu as pltpu


def _round_up(x, m):
    return (x + m - 1) // m * m


def _choose_tm(M, cap=512):
    """Pick the M tile.

    Small M -> one block spanning the full (possibly odd) extent: no padding,
    no slicing.  When cheap (M % 16 == 0) split into two multiple-of-8 blocks
    so a 'parallel' grid axis exists for v7x megacore.  Large M -> `cap`.
    """
    if M <= cap:
        if M >= 16 and M % 16 == 0:
            return M // 2
        return M
    return cap


# ---------------------------------------------------------------------------
# Pallas kernel: y = act(x @ w + b), full-K single-block reduction
# ---------------------------------------------------------------------------
def _matmul_bias_act_kernel(x_ref, w_ref, b_ref, o_ref, *, relu):
    y = jnp.dot(x_ref[...], w_ref[...], preferred_element_type=jnp.float32)
    y = y + b_ref[...]
    if relu:
        y = jnp.maximum(y, 0.0)
    o_ref[...] = y.astype(o_ref.dtype)


def matmul_bias_act(x, w, b, *, relu, out_dtype=jnp.bfloat16):
    """x:(M,K) bf16, w:(K,N) bf16, b:(1,N) f32  ->  (M,N) out_dtype."""
    M, K = x.shape
    _, N = w.shape
    tm = _choose_tm(M)
    Mp = _round_up(M, tm)
    xp = x if Mp == M else jnp.zeros((Mp, K), x.dtype).at[:M].set(x)
    tn = min(N, 128)
    grid = (Mp // tm, N // tn)
    out = pl.pallas_call(
        functools.partial(_matmul_bias_act_kernel, relu=relu),
        out_shape=jax.ShapeDtypeStruct((Mp, N), out_dtype),
        grid_spec=pltpu.PrefetchScalarGridSpec(
            num_scalar_prefetch=0,
            grid=grid,
            in_specs=[
                pl.BlockSpec((tm, K), lambda i, j: (i, 0)),
                pl.BlockSpec((K, tn), lambda i, j: (0, j)),
                pl.BlockSpec((1, tn), lambda i, j: (0, j)),
            ],
            out_specs=pl.BlockSpec((tm, tn), lambda i, j: (i, j)),
        ),
        compiler_params=pltpu.CompilerParams(
            dimension_semantics=("parallel", "parallel")),
    )(xp, w, b)
    return out if Mp == M else out[:M]


# ---------------------------------------------------------------------------
# Pallas kernel: fused tail  q = relu(relu(x @ w3 + b3) @ w4 + b4) @ w5 + b5
# (conv3 with 1x1 spatial output + FC1 + FC2 in a single call)
# ---------------------------------------------------------------------------
def _fused_tail_kernel(x_ref, w3_ref, b3_ref, w4_ref, b4_ref, w5_ref, b5_ref,
                       o_ref):
    h = jnp.dot(x_ref[...], w3_ref[...], preferred_element_type=jnp.float32)
    h = jnp.maximum(h + b3_ref[...], 0.0).astype(w4_ref.dtype)
    h = jnp.dot(h, w4_ref[...], preferred_element_type=jnp.float32)
    h = jnp.maximum(h + b4_ref[...], 0.0).astype(w5_ref.dtype)
    q = jnp.dot(h, w5_ref[...], preferred_element_type=jnp.float32)
    o_ref[...] = (q + b5_ref[...]).astype(o_ref.dtype)


def fused_tail(x, w3, b3, wf1, bf1, wf2, bf2):
    """x:(M,K3) bf16 (conv3 patches == NHWC flatten of conv2 output)."""
    M, K3 = x.shape
    Kf, Hf = wf1.shape
    _, Nq = wf2.shape
    # Cap tm at 128: the (tm, 512) f32 intermediate is the whole vreg file.
    tm = _choose_tm(M, cap=128)
    Mp = _round_up(M, tm)
    xp = x if Mp == M else jnp.zeros((Mp, K3), x.dtype).at[:M].set(x)
    out = pl.pallas_call(
        _fused_tail_kernel,
        out_shape=jax.ShapeDtypeStruct((Mp, Nq), jnp.float32),
        grid_spec=pltpu.PrefetchScalarGridSpec(
            num_scalar_prefetch=0,
            grid=(Mp // tm,),
            in_specs=[
                pl.BlockSpec((tm, K3), lambda i: (i, 0)),
                pl.BlockSpec((K3, w3.shape[1]), lambda i: (0, 0)),
                pl.BlockSpec((1, b3.shape[1]), lambda i: (0, 0)),
                pl.BlockSpec((Kf, Hf), lambda i: (0, 0)),
                pl.BlockSpec((1, Hf), lambda i: (0, 0)),
                pl.BlockSpec((Hf, Nq), lambda i: (0, 0)),
                pl.BlockSpec((1, Nq), lambda i: (0, 0)),
            ],
            out_specs=pl.BlockSpec((tm, Nq), lambda i: (i, 0)),
        ),
        compiler_params=pltpu.CompilerParams(
            dimension_semantics=("parallel",)),
    )(xp, w3, b3, wf1, bf1, wf2, bf2)
    # padded rows (if any) hold garbage and must stay sliced off
    return out if Mp == M else out[:M]


# ---------------------------------------------------------------------------
# Pallas kernel: fused FC head (fallback when conv3 output is not 1x1)
# ---------------------------------------------------------------------------
def _fused_fc_kernel(x_ref, w1_ref, b1_ref, w2_ref, b2_ref, o_ref):
    h = jnp.dot(x_ref[...], w1_ref[...], preferred_element_type=jnp.float32)
    h = jnp.maximum(h + b1_ref[...], 0.0).astype(w2_ref.dtype)
    q = jnp.dot(h, w2_ref[...], preferred_element_type=jnp.float32)
    o_ref[...] = (q + b2_ref[...]).astype(o_ref.dtype)


def fused_fc(x, wf1, bf1, wf2, bf2):
    M, Kf = x.shape
    _, Hf = wf1.shape
    _, Nq = wf2.shape
    tm = _choose_tm(M, cap=128)
    Mp = _round_up(M, tm)
    xp = x if Mp == M else jnp.zeros((Mp, Kf), x.dtype).at[:M].set(x)
    out = pl.pallas_call(
        _fused_fc_kernel,
        out_shape=jax.ShapeDtypeStruct((Mp, Nq), jnp.float32),
        grid_spec=pltpu.PrefetchScalarGridSpec(
            num_scalar_prefetch=0,
            grid=(Mp // tm,),
            in_specs=[
                pl.BlockSpec((tm, Kf), lambda i: (i, 0)),
                pl.BlockSpec((Kf, Hf), lambda i: (0, 0)),
                pl.BlockSpec((1, Hf), lambda i: (0, 0)),
                pl.BlockSpec((Hf, Nq), lambda i: (0, 0)),
                pl.BlockSpec((1, Nq), lambda i: (0, 0)),
            ],
            out_specs=pl.BlockSpec((tm, Nq), lambda i: (i, 0)),
        ),
        compiler_params=pltpu.CompilerParams(
            dimension_semantics=("parallel",)),
    )(xp, wf1, bf1, wf2, bf2)
    return out if Mp == M else out[:M]


# ---------------------------------------------------------------------------
# im2col glue (plain JAX) + conv layer built on the Pallas matmul kernel
# ---------------------------------------------------------------------------
def _im2col(x_nhwc, kh, kw, stride):
    N, H, W, C = x_nhwc.shape
    Ho = (H - kh) // stride + 1
    Wo = (W - kw) // stride + 1
    cols = []
    for i in range(kh):
        for j in range(kw):
            cols.append(x_nhwc[:, i:i + stride * Ho:stride,
                               j:j + stride * Wo:stride, :])
    patches = jnp.stack(cols, axis=3)          # (N, Ho, Wo, kh*kw, C)
    return patches.reshape(N * Ho * Wo, kh * kw * C), (N, Ho, Wo)


def conv2d_bias_relu(x_nhwc, w, b, kh, kw, stride):
    """Output keeps the padded channel count (w.shape[1], zeros beyond c_out)."""
    cols, (N, Ho, Wo) = _im2col(x_nhwc, kh, kw, stride)
    y = matmul_bias_act(cols, w, b, relu=True)
    return y.reshape(N, Ho, Wo, w.shape[1])


# ---------------------------------------------------------------------------
# One-time parameter preparation (padding / transposes / bf16 casts hoisted)
# ---------------------------------------------------------------------------
def prepare_params(params, f_shape):
    c_in, h, w = f_shape

    def conv_out(s, k, st):
        return (s - k) // st + 1

    h1, w1 = conv_out(h, 8, 4), conv_out(w, 8, 4)
    h2, w2 = conv_out(h1, 4, 2), conv_out(w1, 4, 2)
    h3, w3 = conv_out(h2, 3, 1), conv_out(w2, 3, 1)

    def conv_mat(w_oihw, cin_pad, scale=1.0):
        # rows in (kh, kw, c_pad) order, matching im2col's patch layout over
        # the previous layer's padded-channel activation.
        O, I, kh, kw = w_oihw.shape
        m = jnp.transpose(w_oihw, (2, 3, 1, 0)).astype(jnp.float32)  # kh,kw,I,O
        if scale != 1.0:
            m = m * scale
        Op = _round_up(O, 128)
        mp = jnp.zeros((kh, kw, cin_pad, Op), jnp.float32)
        mp = mp.at[:, :, :I, :O].set(m)
        return mp.reshape(kh * kw * cin_pad, Op).astype(jnp.bfloat16)

    def pad_bias(b):
        n = b.shape[0]
        np_ = _round_up(n, 128)
        return jnp.zeros((1, np_), jnp.float32).at[0, :n].set(
            b.astype(jnp.float32))

    c1p = _round_up(32, 128)     # padded channel count after conv1
    c2p = _round_up(64, 128)     # after conv2
    c3p = _round_up(64, 128)     # after conv3

    # FC1: PyTorch Flatten sees NCHW (c, y, x).  Re-order the rows to the
    # padded-channel NHWC layout (y, x, c_pad) the conv stack produces so the
    # forward pass needs no transpose / channel slice before the FC head.
    wfc1 = params["wfc1"].astype(jnp.float32)                   # (64*h3*w3, 512)
    wfc1 = wfc1.reshape(64, h3, w3, 512).transpose(1, 2, 0, 3)  # (h3,w3,64,512)
    wfc1p = jnp.zeros((h3, w3, c3p, 512), jnp.float32).at[:, :, :64, :].set(wfc1)
    wfc1p = wfc1p.reshape(h3 * w3 * c3p, 512).astype(jnp.bfloat16)

    n_act = params["wfc2"].shape[1]
    nq = _round_up(n_act, 128)
    wfc2p = jnp.zeros((512, nq), jnp.float32).at[:, :n_act].set(
        params["wfc2"].astype(jnp.float32)).astype(jnp.bfloat16)

    return {
        # /256 input scale folded into w1 (power-of-two => exact under bf16)
        "w1": conv_mat(params["w1"], c_in, scale=1.0 / 256.0),
        "b1": pad_bias(params["b1"]),
        "w2": conv_mat(params["w2"], c1p),
        "b2": pad_bias(params["b2"]),
        "w3": conv_mat(params["w3"], c2p),
        "b3": pad_bias(params["b3"]),
        "wfc1": wfc1p,
        "bfc1": pad_bias(params["bfc1"]),
        "wfc2": wfc2p,
        "bfc2": pad_bias(params["bfc2"]),
    }


# ---------------------------------------------------------------------------
# DQN forward: conv1, conv2, then fused (conv3 + FC1 + FC2) tail
# ---------------------------------------------------------------------------
def dqn_forward(x_nchw, pp, n_actions):
    x = jnp.transpose(x_nchw.astype(jnp.bfloat16), (0, 2, 3, 1))   # -> NHWC
    h = conv2d_bias_relu(x, pp["w1"], pp["b1"], 8, 8, 4)           # (B,h1,w1,128)
    h = conv2d_bias_relu(h, pp["w2"], pp["b2"], 4, 4, 2)           # (B,h2,w2,128)
    B, h2, w2, cp = h.shape
    h3, w3 = h2 - 3 + 1, w2 - 3 + 1
    if h3 == 1 and w3 == 1:
        # conv3's receptive field covers conv2's whole output: its single
        # im2col patch per image IS the NHWC flatten of h, so conv3+FC1+FC2
        # run as one pallas_call with zero gather glue.
        x3 = h.reshape(B, h2 * w2 * cp)
        q = fused_tail(x3, pp["w3"], pp["b3"], pp["wfc1"], pp["bfc1"],
                       pp["wfc2"], pp["bfc2"])
    else:
        h = conv2d_bias_relu(h, pp["w3"], pp["b3"], 3, 3, 1)       # (B,h3,w3,128)
        flat = h.reshape(B, h3 * w3 * cp)
        q = fused_fc(flat, pp["wfc1"], pp["bfc1"], pp["wfc2"], pp["bfc2"])
    return q[:, :n_actions]


# ---------------------------------------------------------------------------
# Deterministic parameter init (PyTorch-like uniform(-1/sqrt(fan_in), ...))
# ---------------------------------------------------------------------------
def init_params(key, c_in, h, w, n_actions):
    def conv_out(s, k, st):
        return (s - k) // st + 1

    h1, w1 = conv_out(h, 8, 4), conv_out(w, 8, 4)
    h2, w2 = conv_out(h1, 4, 2), conv_out(w1, 4, 2)
    h3, w3 = conv_out(h2, 3, 1), conv_out(w2, 3, 1)
    flat_dim = 64 * h3 * w3

    ks = jax.random.split(key, 10)

    def unif(k, shape, fan_in):
        bound = 1.0 / (fan_in ** 0.5)
        return jax.random.uniform(k, shape, jnp.float32, -bound, bound)

    return {
        "w1": unif(ks[0], (32, c_in, 8, 8), c_in * 8 * 8),
        "b1": unif(ks[1], (32,), c_in * 8 * 8),
        "w2": unif(ks[2], (64, 32, 4, 4), 32 * 4 * 4),
        "b2": unif(ks[3], (64,), 32 * 4 * 4),
        "w3": unif(ks[4], (64, 64, 3, 3), 64 * 3 * 3),
        "b3": unif(ks[5], (64,), 64 * 3 * 3),
        "wfc1": unif(ks[6], (flat_dim, 512), flat_dim),
        "bfc1": unif(ks[7], (512,), flat_dim),
        "wfc2": unif(ks[8], (512, n_actions), 512),
        "bfc2": unif(ks[9], (n_actions,), 512),
    }


# ---------------------------------------------------------------------------
# Pure-JAX f32 reference for the correctness check
# ---------------------------------------------------------------------------
def reference_forward(x_nchw, p):
    dn = ("NCHW", "OIHW", "NCHW")
    x = x_nchw.astype(jnp.float32) / 256.0
    h = jax.lax.conv_general_dilated(x, p["w1"], (4, 4), "VALID",
                                     dimension_numbers=dn)
    h = jnp.maximum(h + p["b1"][None, :, None, None], 0.0)
    h = jax.lax.conv_general_dilated(h, p["w2"], (2, 2), "VALID",
                                     dimension_numbers=dn)
    h = jnp.maximum(h + p["b2"][None, :, None, None], 0.0)
    h = jax.lax.conv_general_dilated(h, p["w3"], (1, 1), "VALID",
                                     dimension_numbers=dn)
    h = jnp.maximum(h + p["b3"][None, :, None, None], 0.0)
    flat = h.reshape(h.shape[0], -1)
    h = jnp.maximum(flat @ p["wfc1"] + p["bfc1"], 0.0)
    return h @ p["wfc2"] + p["bfc2"]


if __name__ == "__main__":
    # small Atari-like setup: batch=2, 4 stacked frames, 36x36, 6 actions
    B, C, H, W, N_ACT = 2, 4, 36, 36, 6
    key = jax.random.PRNGKey(0)
    k_x, k_p = jax.random.split(key)

    x = jax.random.randint(k_x, (B, C, H, W), 0, 256).astype(jnp.uint8)
    params = init_params(k_p, C, H, W, N_ACT)

    # one-time weight layout / padding / bf16 cast (hoisted out of forward)
    pp = jax.tree_util.tree_map(jax.block_until_ready,
                                prepare_params(params, (C, H, W)))

    fwd = jax.jit(dqn_forward, static_argnums=2)
    q = jax.block_until_ready(fwd(x, pp, N_ACT))

    q_ref = jax.block_until_ready(reference_forward(x, params))
    assert q.shape == (B, N_ACT)
    # bf16 weights/activations (f32 accumulate) vs f32 reference -> relaxed tol
    assert jnp.allclose(q, q_ref, rtol=5e-2, atol=1e-2), (
        f"max abs err {jnp.max(jnp.abs(q - q_ref))}")

    print("KERNEL_OK")
</pallas_src>

<mosaic_0001>
module attributes {stable_mosaic.version = 11 : i64} {
  func.func @_matmul_bias_act_kernel(%arg0: i32, %arg1: i32, %arg2: memref<64x256xbf16, #tpu.memory_space<vmem>>, %arg3: memref<256x128xbf16, #tpu.memory_space<vmem>>, %arg4: memref<1x128xf32, #tpu.memory_space<vmem>>, %arg5: memref<64x128xbf16, #tpu.memory_space<vmem>>) attributes {dimension_semantics = [#tpu.dimension_semantics<parallel>, #tpu.dimension_semantics<parallel>], iteration_bounds = array<i64: 2, 1>, scalar_prefetch = 0 : i64, scratch_operands = 0 : i64, tpu.core_type = #tpu.core_type<tc>, window_params = [{transform_indices = @transform_0, window_bounds = array<i64: 64, 256>}, {transform_indices = @transform_1, window_bounds = array<i64: 256, 128>}, {transform_indices = @transform_2, window_bounds = array<i64: 1, 128>}, {transform_indices = @transform_3, window_bounds = array<i64: 64, 128>}]} {
    %c0 = arith.constant 0 : index
    %c0_0 = arith.constant 0 : index
    %0 = vector.load %arg2[%c0, %c0_0] : memref<64x256xbf16, #tpu.memory_space<vmem>>, vector<64x256xbf16>
    %c0_1 = arith.constant 0 : index
    %c0_2 = arith.constant 0 : index
    %1 = vector.load %arg3[%c0_1, %c0_2] : memref<256x128xbf16, #tpu.memory_space<vmem>>, vector<256x128xbf16>
    %cst = arith.constant dense<0.000000e+00> : vector<64x128xf32>
    %2 = tpu.matmul %0, %1, %cst {dimension_numbers = #tpu.dot_dimension_numbers<[1], [0], [0], [1], [0, 0, 1, 1], [], []>} : vector<64x256xbf16>, vector<256x128xbf16>, vector<64x128xf32> -> vector<64x128xf32>
    %c0_3 = arith.constant 0 : index
    %c0_4 = arith.constant 0 : index
    %3 = vector.load %arg4[%c0_3, %c0_4] : memref<1x128xf32, #tpu.memory_space<vmem>>, vector<1x128xf32>
    %4 = vector.broadcast %3 : vector<1x128xf32> to vector<64x128xf32>
    %5 = arith.addf %2, %4 : vector<64x128xf32>
    %cst_5 = arith.constant 0.000000e+00 : f32
    %6 = vector.broadcast %cst_5 : f32 to vector<64x128xf32>
    %7 = arith.maximumf %5, %6 : vector<64x128xf32>
    %8 = arith.truncf %7 : vector<64x128xf32> to vector<64x128xbf16>
    %c0_6 = arith.constant 0 : index
    %c0_7 = arith.constant 0 : index
    %9 = vector.load %arg5[%c0_6, %c0_7] : memref<64x128xbf16, #tpu.memory_space<vmem>>, vector<64x128xbf16>
    tpu.vector_store %arg5[%c0_6, %c0_7], %8 {strides = array<i32>} : memref<64x128xbf16, #tpu.memory_space<vmem>>, vector<64x128xbf16>,
    return
  }
  func.func @transform_0(%arg0: i32, %arg1: i32) -> (i32, i32) {
    %c0_i32 = arith.constant 0 : i32
    %c0_i32_0 = arith.constant 0 : i32
    return %arg0, %c0_i32 : i32, i32
  }
  func.func @transform_1(%arg0: i32, %arg1: i32) -> (i32, i32) {
    %c0_i32 = arith.constant 0 : i32
    %c0_i32_0 = arith.constant 0 : i32
    return %c0_i32, %arg1 : i32, i32
  }
  func.func @transform_2(%arg0: i32, %arg1: i32) -> (i32, i32) {
    %c0_i32 = arith.constant 0 : i32
    %c0_i32_0 = arith.constant 0 : i32
    return %c0_i32, %arg1 : i32, i32
  }
  func.func @transform_3(%arg0: i32, %arg1: i32) -> (i32, i32) {
    %c0_i32 = arith.constant 0 : i32
    return %arg0, %arg1 : i32, i32
  }
}

module attributes {stable_mosaic.version = 11 : i64} {
  func.func @_fused_tail_kernel(%arg0: i32, %arg1: memref<2x1152xbf16, #tpu.memory_space<vmem>>, %arg2: memref<1152x128xbf16, #tpu.memory_space<vmem>>, %arg3: memref<1x128xf32, #tpu.memory_space<vmem>>, %arg4: memref<128x512xbf16, #tpu.memory_space<vmem>>, %arg5: memref<1x512xf32, #tpu.memory_space<vmem>>, %arg6: memref<512x128xbf16, #tpu.memory_space<vmem>>, %arg7: memref<1x128xf32, #tpu.memory_space<vmem>>, %arg8: memref<2x128xf32, #tpu.memory_space<vmem>>) attributes {dimension_semantics = [#tpu.dimension_semantics<parallel>], iteration_bounds = array<i64: 1>, scalar_prefetch = 0 : i64, scratch_operands = 0 : i64, tpu.core_type = #tpu.core_type<tc>, window_params = [{transform_indices = @transform_0, window_bounds = array<i64: 2, 1152>}, {pipeline_mode = #tpu.pipeline_mode<synchronous>, transform_indices = @transform_1, window_bounds = array<i64: 1152, 128>}, {pipeline_mode = #tpu.pipeline_mode<synchronous>, transform_indices = @transform_2, window_bounds = array<i64: 1, 128>}, {pipeline_mode = #tpu.pipeline_mode<synchronous>, transform_indices = @transform_3, window_bounds = array<i64: 128, 512>}, {pipeline_mode = #tpu.pipeline_mode<synchronous>, transform_indices = @transform_4, window_bounds = array<i64: 1, 512>}, {pipeline_mode = #tpu.pipeline_mode<synchronous>, transform_indices = @transform_5, window_bounds = array<i64: 512, 128>}, {pipeline_mode = #tpu.pipeline_mode<synchronous>, transform_indices = @transform_6, window_bounds = array<i64: 1, 128>}, {transform_indices = @transform_7, window_bounds = array<i64: 2, 128>}]} {
    %c0 = arith.constant 0 : index
    %c0_0 = arith.constant 0 : index
    %0 = vector.load %arg1[%c0, %c0_0] : memref<2x1152xbf16, #tpu.memory_space<vmem>>, vector<2x1152xbf16>
    %c0_1 = arith.constant 0 : index
    %c0_2 = arith.constant 0 : index
    %1 = vector.load %arg2[%c0_1, %c0_2] : memref<1152x128xbf16, #tpu.memory_space<vmem>>, vector<1152x128xbf16>
    %cst = arith.constant dense<0.000000e+00> : vector<2x128xf32>
    %2 = tpu.matmul %0, %1, %cst {dimension_numbers = #tpu.dot_dimension_numbers<[1], [0], [0], [1], [0, 0, 1, 1], [], []>} : vector<2x1152xbf16>, vector<1152x128xbf16>, vector<2x128xf32> -> vector<2x128xf32>
    %c0_3 = arith.constant 0 : index
    %c0_4 = arith.constant 0 : index
    %3 = vector.load %arg3[%c0_3, %c0_4] : memref<1x128xf32, #tpu.memory_space<vmem>>, vector<1x128xf32>
    %4 = vector.broadcast %3 : vector<1x128xf32> to vector<2x128xf32>
    %5 = arith.addf %2, %4 : vector<2x128xf32>
    %cst_5 = arith.constant 0.000000e+00 : f32
    %6 = vector.broadcast %cst_5 : f32 to vector<2x128xf32>
    %7 = arith.maximumf %5, %6 : vector<2x128xf32>
    %8 = arith.truncf %7 : vector<2x128xf32> to vector<2x128xbf16>
    %c0_6 = arith.constant 0 : index
    %c0_7 = arith.constant 0 : index
    %9 = vector.load %arg4[%c0_6, %c0_7] : memref<128x512xbf16, #tpu.memory_space<vmem>>, vector<128x512xbf16>
    %cst_8 = arith.constant dense<0.000000e+00> : vector<2x512xf32>
    %10 = tpu.matmul %8, %9, %cst_8 {dimension_numbers = #tpu.dot_dimension_numbers<[1], [0], [0], [1], [0, 0, 1, 1], [], []>} : vector<2x128xbf16>, vector<128x512xbf16>, vector<2x512xf32> -> vector<2x512xf32>
    %c0_9 = arith.constant 0 : index
    %c0_10 = arith.constant 0 : index
    %11 = vector.load %arg5[%c0_9, %c0_10] : memref<1x512xf32, #tpu.memory_space<vmem>>, vector<1x512xf32>
    %12 = vector.broadcast %11 : vector<1x512xf32> to vector<2x512xf32>
    %13 = arith.addf %10, %12 : vector<2x512xf32>
    %cst_11 = arith.constant 0.000000e+00 : f32
    %14 = vector.broadcast %cst_11 : f32 to vector<2x512xf32>
    %15 = arith.maximumf %13, %14 : vector<2x512xf32>
    %16 = arith.truncf %15 : vector<2x512xf32> to vector<2x512xbf16>
    %c0_12 = arith.constant 0 : index
    %c0_13 = arith.constant 0 : index
    %17 = vector.load %arg6[%c0_12, %c0_13] : memref<512x128xbf16, #tpu.memory_space<vmem>>, vector<512x128xbf16>
    %cst_14 = arith.constant dense<0.000000e+00> : vector<2x128xf32>
    %18 = tpu.matmul %16, %17, %cst_14 {dimension_numbers = #tpu.dot_dimension_numbers<[1], [0], [0], [1], [0, 0, 1, 1], [], []>} : vector<2x512xbf16>, vector<512x128xbf16>, vector<2x128xf32> -> vector<2x128xf32>
    %c0_15 = arith.constant 0 : index
    %c0_16 = arith.constant 0 : index
    %19 = vector.load %arg7[%c0_15, %c0_16] : memref<1x128xf32, #tpu.memory_space<vmem>>, vector<1x128xf32>
    %20 = vector.broadcast %19 : vector<1x128xf32> to vector<2x128xf32>
    %21 = arith.addf %18, %20 : vector<2x128xf32>
    %c0_17 = arith.constant 0 : index
    %c0_18 = arith.constant 0 : index
    %22 = vector.load %arg8[%c0_17, %c0_18] : memref<2x128xf32, #tpu.memory_space<vmem>>, vector<2x128xf32>
    tpu.vector_store %arg8[%c0_17, %c0_18], %21 {strides = array<i32>} : memref<2x128xf32, #tpu.memory_space<vmem>>, vector<2x128xf32>,
    return
  }
  func.func @transform_0(%arg0: i32) -> (i32, i32) {
    %c0_i32 = arith.constant 0 : i32
    %c0_i32_0 = arith.constant 0 : i32
    return %arg0, %c0_i32 : i32, i32
  }
  func.func @transform_1(%arg0: i32) -> (i32, i32) {
    %c0_i32 = arith.constant 0 : i32
    %c0_i32_0 = arith.constant 0 : i32
    %c0_i32_1 = arith.constant 0 : i32
    return %c0_i32, %c0_i32_0 : i32, i32
  }
  func.func @transform_2(%arg0: i32) -> (i32, i32) {
    %c0_i32 = arith.constant 0 : i32
    %c0_i32_0 = arith.constant 0 : i32
    %c0_i32_1 = arith.constant 0 : i32
    return %c0_i32, %c0_i32_0 : i32, i32
  }
  func.func @transform_3(%arg0: i32) -> (i32, i32) {
    %c0_i32 = arith.constant 0 : i32
    %c0_i32_0 = arith.constant 0 : i32
    %c0_i32_1 = arith.constant 0 : i32
    return %c0_i32, %c0_i32_0 : i32, i32
  }
  func.func @transform_4(%arg0: i32) -> (i32, i32) {
    %c0_i32 = arith.constant 0 : i32
    %c0_i32_0 = arith.constant 0 : i32
    %c0_i32_1 = arith.constant 0 : i32
    return %c0_i32, %c0_i32_0 : i32, i32
  }
  func.func @transform_5(%arg0: i32) -> (i32, i32) {
    %c0_i32 = arith.constant 0 : i32
    %c0_i32_0 = arith.constant 0 : i32
    %c0_i32_1 = arith.constant 0 : i32
    return %c0_i32, %c0_i32_0 : i32, i32
  }
  func.func @transform_6(%arg0: i32) -> (i32, i32) {
    %c0_i32 = arith.constant 0 : i32
    %c0_i32_0 = arith.constant 0 : i32
    %c0_i32_1 = arith.constant 0 : i32
    return %c0_i32, %c0_i32_0 : i32, i32
  }
  func.func @transform_7(%arg0: i32) -> (i32, i32) {
    %c0_i32 = arith.constant 0 : i32
    %c0_i32_0 = arith.constant 0 : i32
    return %arg0, %c0_i32 : i32, i32
  }
}

module attributes {stable_mosaic.version = 11 : i64} {
  func.func @_matmul_bias_act_kernel(%arg0: i32, %arg1: i32, %arg2: memref<18x2048xbf16, #tpu.memory_space<vmem>>, %arg3: memref<2048x128xbf16, #tpu.memory_space<vmem>>, %arg4: memref<1x128xf32, #tpu.memory_space<vmem>>, %arg5: memref<18x128xbf16, #tpu.memory_space<vmem>>) attributes {dimension_semantics = [#tpu.dimension_semantics<parallel>, #tpu.dimension_semantics<parallel>], iteration_bounds = array<i64: 1, 1>, scalar_prefetch = 0 : i64, scratch_operands = 0 : i64, tpu.core_type = #tpu.core_type<tc>, window_params = [{transform_indices = @transform_0, window_bounds = array<i64: 18, 2048>}, {transform_indices = @transform_1, window_bounds = array<i64: 2048, 128>}, {transform_indices = @transform_2, window_bounds = array<i64: 1, 128>}, {transform_indices = @transform_3, window_bounds = array<i64: 18, 128>}]} {
    %c0 = arith.constant 0 : index
    %c0_0 = arith.constant 0 : index
    %0 = vector.load %arg2[%c0, %c0_0] : memref<18x2048xbf16, #tpu.memory_space<vmem>>, vector<18x2048xbf16>
    %c0_1 = arith.constant 0 : index
    %c0_2 = arith.constant 0 : index
    %1 = vector.load %arg3[%c0_1, %c0_2] : memref<2048x128xbf16, #tpu.memory_space<vmem>>, vector<2048x128xbf16>
    %cst = arith.constant dense<0.000000e+00> : vector<18x128xf32>
    %2 = tpu.matmul %0, %1, %cst {dimension_numbers = #tpu.dot_dimension_numbers<[1], [0], [0], [1], [0, 0, 1, 1], [], []>} : vector<18x2048xbf16>, vector<2048x128xbf16>, vector<18x128xf32> -> vector<18x128xf32>
    %c0_3 = arith.constant 0 : index
    %c0_4 = arith.constant 0 : index
    %3 = vector.load %arg4[%c0_3, %c0_4] : memref<1x128xf32, #tpu.memory_space<vmem>>, vector<1x128xf32>
    %4 = vector.broadcast %3 : vector<1x128xf32> to vector<18x128xf32>
    %5 = arith.addf %2, %4 : vector<18x128xf32>
    %cst_5 = arith.constant 0.000000e+00 : f32
    %6 = vector.broadcast %cst_5 : f32 to vector<18x128xf32>
    %7 = arith.maximumf %5, %6 : vector<18x128xf32>
    %8 = arith.truncf %7 : vector<18x128xf32> to vector<18x128xbf16>
    %c0_6 = arith.constant 0 : index
    %c0_7 = arith.constant 0 : index
    %9 = vector.load %arg5[%c0_6, %c0_7] : memref<18x128xbf16, #tpu.memory_space<vmem>>, vector<18x128xbf16>
    tpu.vector_store %arg5[%c0_6, %c0_7], %8 {strides = array<i32>} : memref<18x128xbf16, #tpu.memory_space<vmem>>, vector<18x128xbf16>,
    return
  }
  func.func @transform_0(%arg0: i32, %arg1: i32) -> (i32, i32) {
    %c0_i32 = arith.constant 0 : i32
    %c0_i32_0 = arith.constant 0 : i32
    return %arg0, %c0_i32 : i32, i32
  }
  func.func @transform_1(%arg0: i32, %arg1: i32) -> (i32, i32) {
    %c0_i32 = arith.constant 0 : i32
    %c0_i32_0 = arith.constant 0 : i32
    return %c0_i32, %arg1 : i32, i32
  }
  func.func @transform_2(%arg0: i32, %arg1: i32) -> (i32, i32) {
    %c0_i32 = arith.constant 0 : i32
    %c0_i32_0 = arith.constant 0 : i32
    return %c0_i32, %arg1 : i32, i32
  }
  func.func @transform_3(%arg0: i32, %arg1: i32) -> (i32, i32) {
    %c0_i32 = arith.constant 0 : i32
    return %arg0, %arg1 : i32, i32
  }
}

</mosaic_0001>

<bundles_post_ra>
// kernel: dqn_forward.3
= control target key start
LH: loop header
LB: loop body
LE: loop exit
PB: predicated region body
PF: predicated region fallthrough
CT: control target
= control target key end

     0   :  { %s858_s12 = smov 0   ;;  %s860_s13 = smov 0   ;;  %s956_s0 = inlined_call_operand.vmem [shape: bf16[128,256], index: 0, kind: input, shape index: {}]   ;;  %s957_s1 = inlined_call_operand.vmem [shape: bf16[256,128], index: 1, kind: input, shape index: {}]   ;;  %s958_s2 = inlined_call_operand.vmem [shape: f32[1,128], index: 2, kind: input, shape index: {}]   ;;  %s959_s3 = inlined_call_operand.vmem [shape: bf16[128,128], index: 3, kind: output, shape index: {}]  }
   0x1   :  { %s862_s14 = smov 0  }
   0x2 LB: > { %s25_s15 = sadd.s32 1, %s832_s13  ;;  %p633_p0 = scmp.ge.s32.totalorder %s836_s14, 1  ;;  %s836_s14 = sphi %s862_s14, %s13_s14   ;;  %s832_s13 = sphi %s860_s13, %s961_s13   ;;  %s828_s12 = sphi %s858_s12, %s960_s12  }
   0x3   : > { %p27_p1 = scmp.ge.s32.totalorder %s25_s15, 2  ;;  %p170_p2 = scmp.lt.s32.totalorder %s836_s14, 3 }
   0x5   : > { %s963_s15 = smov (%p27_p1, %s25_s15), 0  ;;  %p171_p3 = pnand %p633_p0, %p170_p2 }
   0x6   : > { %s634_s18 = sshll.u32 (!%p171_p3), %s828_s12, 3 }
   0x7   : > { %174 = sbr.rel (%p171_p3) target bundleno = 261 (0x105), region = 32  ;;  %p206_p4 = scmp.lt.s32.totalorder (!%p171_p3), %s634_s18, 15 }
   0xc   : > { %v786_v0 = vld [vmem:[%s957_s1 + $0x78] sm:$0xff]   ;;  %v788_v2 = vld [vmem:[%s957_s1 + $0x70] sm:$0xff]   ;;  %v790_v4 = vld [vmem:[%s957_s1 + $0x68] sm:$0xff]   ;;  %s965_s18 = smov (!%p206_p4, %s634_s18), 15 }
   0xd   : > { %v787_v1 = vld [vmem:[%s957_s1 + $0x38] sm:$0xff]   ;;  %706 = vmatprep.subr.bf16.mxu0 %v786_v0  ;;  %746 = vmatprep.subr.bf16.mxu1 %v786_v0  ;;  %v789_v3 = vld [vmem:[%s957_s1 + $0x30] sm:$0xff]   ;;  %v791_v5 = vld [vmem:[%s957_s1 + $0x28] sm:$0xff]   ;;  %s674_s6 = sshll.u32 %s965_s18, 3  ;;  %s638_s5 = sshll.u32 %s965_s18, 2 }
   0xe   : > { %707 = vmatpush3.bf16.msra.mxu0 %v787_v1  ;;  %754 = vmatpush3.bf16.msra.mxu1 %v787_v1  ;;  %v792_v6 = vld [vmem:[%s957_s1 + $0x60] sm:$0xff]   ;;  %v794_v8 = vld [vmem:[%s957_s1 + $0x58] sm:$0xff]   ;;  %s909_s11 = scalar_lea.vmem %s956_s0, %s674_s6  ;;  %v796_v10 = vld [vmem:[%s957_s1 + $0x50] sm:$0xff]   ;;  %s226_s8 = scalar_lea.vmem %s959_s3, %s638_s5 }
   0xf   : > { %708 = vmatprep.subr.bf16.mxu0 %v788_v2  ;;  %747 = vmatprep.subr.bf16.mxu1 %v788_v2  ;;  %v793_v7 = vld [vmem:[%s957_s1 + $0x20] sm:$0xff]   ;;  %v795_v9 = vld [vmem:[%s957_s1 + $0x18] sm:$0xff]   ;;  %v797_v13 = vld [vmem:[%s957_s1 + $0x10] sm:$0xff]  }
  0x10   : > { %v804_v11 = vld [vmem:[%s909_s11 + $0x4] ss:$8 sps:$4 sm:$0xff]   ;;  %v802_v18 = vld [vmem:[%s909_s11] ss:$8 sps:$4 sm:$0xff]   ;;  %v808_v20 = vld [vmem:[%s909_s11 + $0x14] ss:$8 sps:$4 sm:$0xff]  }
  0x11   : > { %v807_v12 = vld [vmem:[%s909_s11 + $0x24] ss:$8 sps:$4 sm:$0xff]   ;;  %444 = vmatprep.mubr.bf16.mxu0 %v804_v11  ;;  %v805_v19 = vld [vmem:[%s909_s11 + $0x20] ss:$8 sps:$4 sm:$0xff]   ;;  %v810_v21 = vld [vmem:[%s909_s11 + $0x34] ss:$8 sps:$4 sm:$0xff]  }
  0x12   : > { %709 = vmatpush3.bf16.msra.mxu0 %v789_v3  ;;  %755 = vmatpush3.bf16.msra.mxu1 %v789_v3  ;;  %v798_v14 = vld [vmem:[%s957_s1 + $0x48] sm:$0xff]   ;;  %v800_v16 = vld [vmem:[%s957_s1 + $0x40] sm:$0xff]   ;;  %v812_v22 = vld [vmem:[%s909_s11 + $0x10] ss:$8 sps:$4 sm:$0xff]  }
  0x13   : > { %710 = vmatprep.subr.bf16.mxu0 %v790_v4  ;;  %748 = vmatprep.subr.bf16.mxu1 %v790_v4  ;;  %v799_v15 = vld [vmem:[%s957_s1 + $0x8] sm:$0xff]   ;;  %v801_v17 = vld [vmem:[%s957_s1] sm:$0xff]   ;;  %v813_v23 = vld [vmem:[%s909_s11 + $0x30] ss:$8 sps:$4 sm:$0xff]  }
  0x14   : > { %460 = vmatprep.mubr.bf16.mxu1 %v807_v12  ;;  %v639_v28 = vld [vmem:[%s958_s2] ss:$0 sm:$0xff] }
  0x16   : > { %711 = vmatpush3.bf16.msra.mxu0 %v791_v5  ;;  %756 = vmatpush3.bf16.msra.mxu1 %v791_v5 }
  0x17   : > { %712 = vmatprep.subr.bf16.mxu0 %v792_v6  ;;  %749 = vmatprep.subr.bf16.mxu1 %v792_v6 }
  0x1a   : > { %713 = vmatpush3.bf16.msra.mxu0 %v793_v7  ;;  %757 = vmatpush3.bf16.msra.mxu1 %v793_v7 }
  0x1b   : > { %714 = vmatprep.subr.bf16.mxu0 %v794_v8  ;;  %750 = vmatprep.subr.bf16.mxu1 %v794_v8 }
  0x1e   : > { %715 = vmatpush3.bf16.msra.mxu0 %v795_v9  ;;  %758 = vmatpush3.bf16.msra.mxu1 %v795_v9 }
  0x1f   : > { %716 = vmatprep.subr.bf16.mxu0 %v796_v10  ;;  %751 = vmatprep.subr.bf16.mxu1 %v796_v10 }
  0x22   : > { %717 = vmatpush3.bf16.msra.mxu0 %v797_v13  ;;  %759 = vmatpush3.bf16.msra.mxu1 %v797_v13 }
  0x23   : > { %718 = vmatprep.subr.bf16.mxu0 %v798_v14  ;;  %752 = vmatprep.subr.bf16.mxu1 %v798_v14 }
  0x26   : > { %719 = vmatpush3.bf16.msra.mxu0 %v799_v15  ;;  %760 = vmatpush3.bf16.msra.mxu1 %v799_v15 }
  0x27   : > { %720 = vmatprep.subr.bf16.mxu0 %v800_v16  ;;  %753 = vmatprep.subr.bf16.mxu1 %v800_v16 }
  0x2a   : > { %721 = vmatpush3.bf16.msra.mxu0 %v801_v17  ;;  %761 = vmatpush3.bf16.msra.mxu1 %v801_v17 }
  0x2d   : > { %445 = vmatmul.mubr.bf16.vlgmr.msra.gmra.mxu0 %v802_v18  ;;  %461 = vmatmul.mubr.bf16.vlgmr.msra.gmra.mxu1 %v805_v19 }
  0x2e   : > { %452 = vmatprep.mubr.bf16.mxu0 %v808_v20  ;;  %468 = vmatprep.mubr.bf16.mxu1 %v810_v21 }
  0x35   : > { %453 = vmatmul.mubr.bf16.gmra.mxu0 %v812_v22  ;;  %469 = vmatmul.mubr.bf16.gmra.mxu1 %v813_v23 }
  0xed   : > { %v722_v24 = vpop.f32.mrf.mxu0  ;;  %v734_v25 = vpop.f32.mrf.mxu1 }
  0xef   : > { %v723_v26 = vpop.f32.mrf.mxu0  ;;  %v735_v27 = vpop.f32.mrf.mxu1 }
  0xf0   : > { %v724_v29 = vadd.f32 %v723_v26, %v722_v24  ;;  %v736_v30 = vadd.f32 %v735_v27, %v734_v25 }
  0xf1   : > { %v725_v31 = vpop.f32.mrf.mxu0  ;;  %v737_v32 = vpop.f32.mrf.mxu1 }
  0xf2   : > { %v447_v33 = vadd.f32 %v724_v29, %v639_v28  ;;  %v463_v34 = vadd.f32 %v736_v30, %v639_v28 }
  0xf3   : > { %v726_v35 = vpop.f32.mrf.mxu0  ;;  %v738_v36 = vpop.f32.mrf.mxu1 }
  0xf4   : > { %v727_v37 = vadd.f32 %v726_v35, %v725_v31  ;;  %v739_v38 = vadd.f32 %v738_v36, %v737_v32  ;;  %v477_v43 = vmax.f32 %v447_v33, 0.0  ;;  %v481_v44 = vmax.f32 %v463_v34, 0.0 }
  0xf5   : > { %v728_v39 = vpop.f32.mrf.mxu0  ;;  %v740_v40 = vpop.f32.mrf.mxu1 }
  0xf6   : > { %v450_v41 = vadd.f32 %v727_v37, %v639_v28  ;;  %v466_v42 = vadd.f32 %v739_v38, %v639_v28 }
  0xf7   : > { %v729_v45 = vpop.f32.mrf.mxu0  ;;  %v741_v46 = vpop.f32.mrf.mxu1 }
  0xf8   : > { %v478_v47 = vmax.f32 %v450_v41, 0.0  ;;  %v482_v48 = vmax.f32 %v466_v42, 0.0  ;;  %v730_v49 = vadd.f32 %v729_v45, %v728_v39  ;;  %v742_v50 = vadd.f32 %v741_v46, %v740_v40 }
  0xf9   : > { %v731_v51 = vpop.f32.mrf.mxu0  ;;  %v743_v52 = vpop.f32.mrf.mxu1 }
  0xfa   : > { %v686_v53 = vpack.c.bf16 %v478_v47, %v477_v43  ;;  %v696_v54 = vpack.c.bf16 %v482_v48, %v481_v44  ;;  %v455_v57 = vadd.f32 %v730_v49, %v639_v28  ;;  %v471_v58 = vadd.f32 %v742_v50, %v639_v28 }
  0xfb   : > { %v732_v55 = vpop.f32.mrf.mxu0  ;;  %v744_v56 = vpop.f32.mrf.mxu1 }
  0xfc   : > { %687 = vst [vmem:[%s226_s8] sm:$0xff] %v686_v53   ;;  %704 = vst [vmem:[%s226_s8 + $0x10] sm:$0xff] %v696_v54   ;;  %v733_v59 = vadd.f32 %v732_v55, %v731_v51  ;;  %v745_v60 = vadd.f32 %v744_v56, %v743_v52  ;;  %v479_v63 = vmax.f32 %v455_v57, 0.0  ;;  %v483_v0 = vmax.f32 %v471_v58, 0.0 }
  0xfe   : > { %v458_v61 = vadd.f32 %v733_v59, %v639_v28  ;;  %v474_v62 = vadd.f32 %v745_v60, %v639_v28 }
 0x100   : > { %v480_v1 = vmax.f32 %v458_v61, 0.0  ;;  %v484_v2 = vmax.f32 %v474_v62, 0.0 }
 0x102   : > { %v691_v3 = vpack.c.bf16 %v480_v1, %v479_v63  ;;  %v701_v4 = vpack.c.bf16 %v484_v2, %v483_v0 }
 0x104   : > { %703 = vst [vmem:[%s226_s8 + $0x8] sm:$0xff] %v691_v3   ;;  %705 = vst [vmem:[%s226_s8 + $0x18] sm:$0xff] %v701_v4  }
 0x105 PF: > { %s13_s14 = sadd.s32 1, %s836_s14   ;;  %s960_s12 = smov %s832_s13 }
 0x106   : > { %p10_p5 = scmp.ge.s32.totalorder %s13_s14, 4   ;;  %s961_s13 = smov %s963_s15 }
 0x108   :  { %12 = sbr.rel (!%p10_p5) target bundleno = 2 (0x2), region = 68 }

// kernel: dqn_forward.5
= control target key start
LH: loop header
LB: loop body
LE: loop exit
PB: predicated region body
PF: predicated region fallthrough
CT: control target
= control target key end

     0   :  { %v187_v27 = vlaneseq  ;;  %v2031_v35 = vmov 1966171168   ;;  %vm2033_vm0 = vmmov 0   ;;  %s2523_s0 = inlined_call_operand.vmem [shape: bf16[2,1152], index: 0, kind: input, shape index: {}]   ;;  %s2524_s1 = inlined_call_operand.vmem [shape: bf16[1152,128], index: 1, kind: input, shape index: {}]   ;;  %s2525_s2 = inlined_call_operand.vmem [shape: f32[1,128], index: 2, kind: input, shape index: {}]   ;;  %s2526_s3 = inlined_call_operand.vmem [shape: bf16[128,512], index: 3, kind: input, shape index: {}]   ;;  %s2527_s4 = inlined_call_operand.vmem [shape: f32[1,512], index: 4, kind: input, shape index: {}]   ;;  %s2528_s5 = inlined_call_operand.vmem [shape: bf16[512,128], index: 5, kind: input, shape index: {}]   ;;  %s2529_s6 = inlined_call_operand.vmem [shape: f32[1,128], index: 6, kind: input, shape index: {}]   ;;  %s2530_s7 = inlined_call_operand.hbm [shape: f32[2,128], index: 7, kind: output, shape index: {}]  }
   0x1   :  { %v1856_v0 = vld [vmem:[%s2524_s1 + $0x78] sm:$0xff]   ;;  %v1860_v4 = vld [vmem:[%s2524_s1 + $0x70] sm:$0xff]   ;;  %v1864_v8 = vld [vmem:[%s2524_s1 + $0x68] sm:$0xff]   ;;  %v185_v36 = vunpack.c.l.s4 %v2031_v35 }
   0x2   :  { %v1857_v1 = vld [vmem:[%s2524_s1 + $0x38] sm:$0xff]   ;;  %1690 = vmatprep.subr.bf16.mxu0 %v1856_v0  ;;  %v1861_v5 = vld [vmem:[%s2524_s1 + $0x30] sm:$0xff]   ;;  %v1865_v9 = vld [vmem:[%s2524_s1 + $0x28] sm:$0xff]   ;;  %v2169_v32 = vshrl.u32 %v187_v27, 7 }
   0x3   :  { %v1858_v2 = vld [vmem:[%s2524_s1 + $0xf8] sm:$0xff]   ;;  %1691 = vmatpush3.bf16.msra.mxu0 %v1857_v1  ;;  %v1862_v6 = vld [vmem:[%s2524_s1 + $0xf0] sm:$0xff]   ;;  %v1866_v10 = vld [vmem:[%s2524_s1 + $0xe8] sm:$0xff]   ;;  %v186_v39 = vunpack.c.0.s8 %v185_v36 }
   0x4   :  { %v1859_v3 = vld [vmem:[%s2524_s1 + $0xb8] sm:$0xff]   ;;  %1712 = vmatprep.subr.bf16.mxu1 %v1858_v2  ;;  %1692 = vmatprep.subr.bf16.mxu0 %v1860_v4  ;;  %v1863_v7 = vld [vmem:[%s2524_s1 + $0xb0] sm:$0xff]   ;;  %v1867_v11 = vld [vmem:[%s2524_s1 + $0xa8] sm:$0xff]  }
   0x5   :  { %1713 = vmatpush3.bf16.msra.mxu1 %v1859_v3  ;;  %v1868_v12 = vld [vmem:[%s2524_s1 + $0x60] sm:$0xff]   ;;  %v1872_v16 = vld [vmem:[%s2524_s1 + $0x58] sm:$0xff]   ;;  %v1876_v20 = vld [vmem:[%s2524_s1 + $0x50] sm:$0xff]   ;;  %v2184_v41 = vsub.s32 %v186_v39, %v2169_v32 }
   0x6   :  { %1714 = vmatprep.subr.bf16.mxu1 %v1862_v6  ;;  %v1869_v13 = vld [vmem:[%s2524_s1 + $0x20] sm:$0xff]   ;;  %v1873_v17 = vld [vmem:[%s2524_s1 + $0x18] sm:$0xff]   ;;  %v1877_v21 = vld [vmem:[%s2524_s1 + $0x10] sm:$0xff]  }
   0x7   :  { %1693 = vmatpush3.bf16.msra.mxu0 %v1861_v5  ;;  %v1870_v14 = vld [vmem:[%s2524_s1 + $0xe0] sm:$0xff]   ;;  %v1874_v18 = vld [vmem:[%s2524_s1 + $0xd8] sm:$0xff]   ;;  %v1878_v22 = vld [vmem:[%s2524_s1 + $0xd0] sm:$0xff]  }
   0x8   :  { %1694 = vmatprep.subr.bf16.mxu0 %v1864_v8  ;;  %v1871_v15 = vld [vmem:[%s2524_s1 + $0xa0] sm:$0xff]   ;;  %v1875_v19 = vld [vmem:[%s2524_s1 + $0x98] sm:$0xff]   ;;  %v1879_v23 = vld [vmem:[%s2524_s1 + $0x90] sm:$0xff]  }
   0x9   :  { %1715 = vmatpush3.bf16.msra.mxu1 %v1863_v7  ;;  %v1880_v24 = vld [vmem:[%s2524_s1 + $0x48] sm:$0xff]   ;;  %v1884_v29 = vld [vmem:[%s2524_s1 + $0x40] sm:$0xff]   ;;  %v1889_v37 = vld [vmem:[%s2524_s1 + $0x178] sm:$0xff]  }
   0xa   :  { %1716 = vmatprep.subr.bf16.mxu1 %v1866_v10  ;;  %v1881_v25 = vld [vmem:[%s2524_s1 + $0x8] sm:$0xff]   ;;  %v1885_v30 = vld [vmem:[%s2524_s1] sm:$0xff]   ;;  %v1891_v40 = vld [vmem:[%s2524_s1 + $0x1f8] sm:$0xff]  }
   0xb   :  { %1695 = vmatpush3.bf16.msra.mxu0 %v1865_v9  ;;  %v1882_v26 = vld [vmem:[%s2524_s1 + $0xc8] sm:$0xff]   ;;  %v1886_v31 = vld [vmem:[%s2524_s1 + $0xc0] sm:$0xff]   ;;  %v1890_v48 = vld [vmem:[%s2524_s1 + $0x138] sm:$0xff]  }
   0xc   :  { %1696 = vmatprep.subr.bf16.mxu0 %v1868_v12  ;;  %v1883_v28 = vld [vmem:[%s2524_s1 + $0x88] sm:$0xff]   ;;  %v28_v33 = vld [vmem:[%s2523_s0] sm:$0xff]  ;;  %v1893_v51 = vld [vmem:[%s2524_s1 + $0x170] sm:$0xff]  }
   0xd   :  { %1717 = vmatpush3.bf16.msra.mxu1 %v1867_v11  ;;  %v1888_v34 = vld [vmem:[%s2524_s1 + $0x80] sm:$0xff]   ;;  %v183_v38 = vcombine.high %v28_v33, %v28_v33  ;;  %v190_v42 = vrot.slane %v28_v33, %v2184_v41  ;;  %v1892_v53 = vld [vmem:[%s2524_s1 + $0x1b8] sm:$0xff]   ;;  %v1895_v54 = vld [vmem:[%s2524_s1 + $0x1f0] sm:$0xff]  }
   0xe   :  { %1718 = vmatprep.subr.bf16.mxu1 %v1870_v14  ;;  %v1894_v56 = vld [vmem:[%s2524_s1 + $0x130] sm:$0xff]   ;;  %v1897_v57 = vld [vmem:[%s2524_s1 + $0x168] sm:$0xff]   ;;  %v1901_v61 = vld [vmem:[%s2524_s1 + $0x160] sm:$0xff]  }
   0xf   :  { %1697 = vmatpush3.bf16.msra.mxu0 %v1869_v13  ;;  %v2188_v43 = vrot.slane %v183_v38, %v2184_v41  ;;  %v198_v44 = vcombine.high %v190_v42, %v190_v42  ;;  %v206_v45 = vrot.slane %v190_v42, %v2184_v41  ;;  %v1896_v58 = vld [vmem:[%s2524_s1 + $0x1b0] sm:$0xff]   ;;  %v1899_v59 = vld [vmem:[%s2524_s1 + $0x1e8] sm:$0xff]   ;;  %v1903_v63 = vld [vmem:[%s2524_s1 + $0x1e0] sm:$0xff]  }
  0x10   :  { %1698 = vmatprep.subr.bf16.mxu0 %v1872_v16  ;;  %v1898_v60 = vld [vmem:[%s2524_s1 + $0x128] sm:$0xff]   ;;  %v1902_v0 = vld [vmem:[%s2524_s1 + $0x120] sm:$0xff]   ;;  %v1905_v1 = vld [vmem:[%s2524_s1 + $0x158] sm:$0xff]  }
  0x11   :  { %1719 = vmatpush3.bf16.msra.mxu1 %v1871_v15  ;;  %v199_v46 = vcombine.high %v2188_v43, %v2188_v43  ;;  %v220_v47 = vrot.slane %v198_v44, %v2184_v41  ;;  %v228_v50 = vcombine.high %v206_v45, %v206_v45  ;;  %v1900_v62 = vld [vmem:[%s2524_s1 + $0x1a8] sm:$0xff]   ;;  %v1904_v2 = vld [vmem:[%s2524_s1 + $0x1a0] sm:$0xff]   ;;  %v1907_v3 = vld [vmem:[%s2524_s1 + $0x1d8] sm:$0xff]  }
  0x12   :  { %1720 = vmatprep.subr.bf16.mxu1 %v1874_v18  ;;  %v1906_v4 = vld [vmem:[%s2524_s1 + $0x118] sm:$0xff]   ;;  %v1909_v5 = vld [vmem:[%s2524_s1 + $0x150] sm:$0xff]   ;;  %v1913_v9 = vld [vmem:[%s2524_s1 + $0x148] sm:$0xff]  }
  0x13   :  { %1699 = vmatpush3.bf16.msra.mxu0 %v1873_v17  ;;  %v227_v49 = vrot.slane %v199_v46, %v2184_v41  ;;  %719 = vmatprep.mubr.bf16.mxu0 %v220_v47  ;;  %v230_v52 = vcombine.high %v220_v47, %v220_v47  ;;  %v1908_v6 = vld [vmem:[%s2524_s1 + $0x198] sm:$0xff]   ;;  %v1911_v7 = vld [vmem:[%s2524_s1 + $0x1d0] sm:$0xff]   ;;  %v1915_v11 = vld [vmem:[%s2524_s1 + $0x1c8] sm:$0xff]   ;;  %v213_v17 = vrot.slane %v2188_v43, %v2184_v41 }
  0x14   :  { %1700 = vmatprep.subr.bf16.mxu0 %v1876_v20  ;;  %v1910_v8 = vld [vmem:[%s2524_s1 + $0x110] sm:$0xff]   ;;  %v1914_v12 = vld [vmem:[%s2524_s1 + $0x108] sm:$0xff]   ;;  %v1917_v13 = vld [vmem:[%s2524_s1 + $0x140] sm:$0xff]   ;;  %v2032_v20 = vmov 0.0  }
  0x15   :  { %1721 = vmatpush3.bf16.msra.mxu1 %v1875_v19  ;;  %v231_v55 = vcombine.high %v227_v49, %v227_v49  ;;  %759 = vmatprep.mubr.bf16.mxu1 %v230_v52  ;;  %v1912_v10 = vld [vmem:[%s2524_s1 + $0x190] sm:$0xff]   ;;  %v1916_v14 = vld [vmem:[%s2524_s1 + $0x188] sm:$0xff]   ;;  %v1919_v15 = vld [vmem:[%s2524_s1 + $0x1c0] sm:$0xff]  }
  0x16   :  { %1722 = vmatprep.subr.bf16.mxu1 %v1878_v22  ;;  %v1918_v16 = vld [vmem:[%s2524_s1 + $0x100] sm:$0xff]   ;;  %v1921_v19 = vld [vmem:[%s2524_s1 + $0x238] sm:$0xff]   ;;  %v1922_v22 = vld [vmem:[%s2524_s1 + $0x230] sm:$0xff]  }
  0x17   :  { %1701 = vmatpush3.bf16.msra.mxu0 %v1877_v21  ;;  %v1920_v18 = vld [vmem:[%s2524_s1 + $0x180] sm:$0xff]   ;;  %v229_v21 = vcombine.high %v213_v17, %v213_v17  ;;  %v1927_v27 = vld [vmem:[%s2524_s1 + $0x208] sm:$0xff]  }
  0x18   :  { %1702 = vmatprep.subr.bf16.mxu0 %v1880_v24  ;;  %v1924_v24 = vld [vmem:[%s2524_s1 + $0x220] sm:$0xff]  }
  0x19   :  { %1723 = vmatpush3.bf16.msra.mxu1 %v1879_v23  ;;  %v1923_v23 = vld [vmem:[%s2524_s1 + $0x228] sm:$0xff]  }
  0x1a   :  { %1724 = vmatprep.subr.bf16.mxu1 %v1882_v26  ;;  %v1926_v26 = vld [vmem:[%s2524_s1 + $0x210] sm:$0xff]  }
  0x1b   :  { %1703 = vmatpush3.bf16.msra.mxu0 %v1881_v25  ;;  %v1925_v25 = vld [vmem:[%s2524_s1 + $0x218] sm:$0xff]  }
  0x1c   :  { %1704 = vmatprep.subr.bf16.mxu0 %v1884_v29  ;;  %v1552_v29 = vld.sshfl [vmem:[%s2523_s0 + $0x8] sm:$0x1 pattern:$0x75316420] }
  0x1d   :  { %1725 = vmatpush3.bf16.msra.mxu1 %v1883_v28  ;;  %v1928_v28 = vld [vmem:[%s2524_s1 + $0x200] sm:$0xff]  }
  0x1e   :  { %1726 = vmatprep.subr.bf16.mxu1 %v1886_v31 }
  0x1f   :  { %1705 = vmatpush3.bf16.msra.mxu0 %v1885_v30 }
  0x20   :  { %1734 = vmatprep.subr.bf16.mxu0 %v1889_v37 }
  0x21   :  { %1727 = vmatpush3.bf16.msra.mxu1 %v1888_v34 }
  0x22   :  { %1756 = vmatprep.subr.bf16.mxu1 %v1891_v40  ;;  %720 = vmatmul.mubr.bf16.vlgmr.msra.gmra.mxu0 %v206_v45 }
  0x23   :  { %1735 = vmatpush3.bf16.msra.mxu0 %v1890_v48  ;;  %799 = vmatprep.mubr.bf16.mxu0 %v227_v49 }
  0x24   :  { %760 = vmatmul.mubr.bf16.vlgmr.msra.gmra.mxu1 %v228_v50  ;;  %1736 = vmatprep.subr.bf16.mxu0 %v1893_v51 }
  0x25   :  { %1757 = vmatpush3.bf16.msra.mxu1 %v1892_v53  ;;  %839 = vmatprep.mubr.bf16.mxu1 %v231_v55 }
  0x26   :  { %1758 = vmatprep.subr.bf16.mxu1 %v1895_v54 }
  0x27   :  { %1737 = vmatpush3.bf16.msra.mxu0 %v1894_v56 }
  0x28   :  { %1738 = vmatprep.subr.bf16.mxu0 %v1897_v57 }
  0x29   :  { %1759 = vmatpush3.bf16.msra.mxu1 %v1896_v58 }
  0x2a   :  { %1760 = vmatprep.subr.bf16.mxu1 %v1899_v59 }
  0x2b   :  { %1739 = vmatpush3.bf16.msra.mxu0 %v1898_v60 }
  0x2c   :  { %1740 = vmatprep.subr.bf16.mxu0 %v1901_v61 }
  0x2d   :  { %1761 = vmatpush3.bf16.msra.mxu1 %v1900_v62 }
  0x2e   :  { %1762 = vmatprep.subr.bf16.mxu1 %v1903_v63 }
  0x2f   :  { %1741 = vmatpush3.bf16.msra.mxu0 %v1902_v0 }
  0x30   :  { %1742 = vmatprep.subr.bf16.mxu0 %v1905_v1 }
  0x31   :  { %1763 = vmatpush3.bf16.msra.mxu1 %v1904_v2 }
  0x32   :  { %1764 = vmatprep.subr.bf16.mxu1 %v1907_v3 }
  0x33   :  { %1743 = vmatpush3.bf16.msra.mxu0 %v1906_v4 }
  0x34   :  { %1744 = vmatprep.subr.bf16.mxu0 %v1909_v5 }
  0x35   :  { %1765 = vmatpush3.bf16.msra.mxu1 %v1908_v6 }
  0x36   :  { %1766 = vmatprep.subr.bf16.mxu1 %v1911_v7 }
  0x37   :  { %1745 = vmatpush3.bf16.msra.mxu0 %v1910_v8 }
  0x38   :  { %1746 = vmatprep.subr.bf16.mxu0 %v1913_v9 }
  0x39   :  { %1767 = vmatpush3.bf16.msra.mxu1 %v1912_v10 }
  0x3a   :  { %1768 = vmatprep.subr.bf16.mxu1 %v1915_v11 }
  0x3b   :  { %1747 = vmatpush3.bf16.msra.mxu0 %v1914_v12 }
  0x3c   :  { %1748 = vmatprep.subr.bf16.mxu0 %v1917_v13 }
  0x3d   :  { %1769 = vmatpush3.bf16.msra.mxu1 %v1916_v14 }
  0x3e   :  { %1770 = vmatprep.subr.bf16.mxu1 %v1919_v15 }
  0x3f   :  { %1749 = vmatpush3.bf16.msra.mxu0 %v1918_v16 }
  0x40   :  { %1831 = vmatprep.subr.bf16.mxu0 %v2032_v20 }
  0x41   :  { %1771 = vmatpush3.bf16.msra.mxu1 %v1920_v18 }
  0x42   :  { %800 = vmatmul.mubr.bf16.vlgmr.msra.gmra.mxu0 %v213_v17 }
  0x43   :  { %1832 = vmatpush3.bf16.msra.mxu0 %v1921_v19  ;;  %1847 = vmatprep.mubr.msk.bf16.mxu0 %vm2033_vm0, %v2032_v20 }
  0x44   :  { %840 = vmatmul.mubr.bf16.vlgmr.msra.gmra.mxu1 %v229_v21  ;;  %1833 = vmatprep.subr.bf16.mxu0 %v2032_v20 }
  0x47   :  { %1834 = vmatpush3.bf16.msra.mxu0 %v1922_v22 }
  0x48   :  { %1835 = vmatprep.subr.bf16.mxu0 %v2032_v20 }
  0x4b   :  { %1836 = vmatpush3.bf16.msra.mxu0 %v1923_v23 }
  0x4c   :  { %1837 = vmatprep.subr.bf16.mxu0 %v2032_v20 }
  0x4f   :  { %1838 = vmatpush3.bf16.msra.mxu0 %v1924_v24 }
  0x50   :  { %1839 = vmatprep.subr.bf16.mxu0 %v2032_v20 }
  0x53   :  { %1840 = vmatpush3.bf16.msra.mxu0 %v1925_v25 }
  0x54   :  { %1841 = vmatprep.subr.bf16.mxu0 %v2032_v20 }
  0x57   :  { %1842 = vmatpush3.bf16.msra.mxu0 %v1926_v26 }
  0x58   :  { %1843 = vmatprep.subr.bf16.mxu0 %v2032_v20 }
  0x5b   :  { %1844 = vmatpush3.bf16.msra.mxu0 %v1927_v27 }
  0x5c   :  { %1845 = vmatprep.subr.bf16.mxu0 %v2032_v20 }
  0x5d   :  { %12 = vsyncpa [#allocation3], 0  ;;  %v245_v30 = vrot.slane %v1552_v29, %v2184_v41  ;;  %v1931_v31 = vld [vmem:[%s2526_s3 + $0xe4] ss:$16 sps:$4 sm:$0xff]   ;;  %v1934_v33 = vld [vmem:[%s2526_s3 + $0xec] ss:$16 sps:$4 sm:$0xff]  }
  0x5e   :  { %v1929_v34 = vld [vmem:[%s2526_s3 + $0xe0] ss:$16 sps:$4 sm:$0xff]   ;;  %v1932_v35 = vld [vmem:[%s2526_s3 + $0xe8] ss:$16 sps:$4 sm:$0xff]   ;;  %1103 = vmatprep.subr.bf16.mxu1 %v1931_v31  ;;  %v1937_v36 = vld [vmem:[%s2526_s3 + $0xc4] ss:$16 sps:$4 sm:$0xff]  }
  0x5f   :  { %1846 = vmatpush3.bf16.msra.mxu0 %v1928_v28  ;;  %v1940_v37 = vld [vmem:[%s2526_s3 + $0xcc] ss:$16 sps:$4 sm:$0xff]   ;;  %1104 = vmatpush1.bf16.msra.mxu1 %v1929_v34  ;;  %v1935_v38 = vld [vmem:[%s2526_s3 + $0xc0] ss:$16 sps:$4 sm:$0xff]   ;;  %v1938_v39 = vld [vmem:[%s2526_s3 + $0xc8] ss:$16 sps:$4 sm:$0xff]  }
  0x60   :  { %1144 = vmatprep.subr.bf16.mxu0 %v1934_v33  ;;  %1105 = vmatprep.subr.bf16.mxu1 %v1937_v36  ;;  %v1943_v40 = vld [vmem:[%s2526_s3 + $0xa4] ss:$16 sps:$4 sm:$0xff]   ;;  %v1946_v41 = vld [vmem:[%s2526_s3 + $0xac] ss:$16 sps:$4 sm:$0xff]   ;;  %v1941_v42 = vld [vmem:[%s2526_s3 + $0xa0] ss:$16 sps:$4 sm:$0xff]  }
  0x61   :  { %v1944_v43 = vld [vmem:[%s2526_s3 + $0xa8] ss:$16 sps:$4 sm:$0xff]   ;;  %v1949_v44 = vld [vmem:[%s2526_s3 + $0x84] ss:$16 sps:$4 sm:$0xff]   ;;  %v1952_v45 = vld [vmem:[%s2526_s3 + $0x8c] ss:$16 sps:$4 sm:$0xff]  }
  0x62   :  { %1848 = vmatmul.mubr.bf16.vlgmr.msra.gmra.mxu0 %v245_v30  ;;  %v1947_v46 = vld [vmem:[%s2526_s3 + $0x80] ss:$16 sps:$4 sm:$0xff]   ;;  %v1950_v47 = vld [vmem:[%s2526_s3 + $0x88] ss:$16 sps:$4 sm:$0xff]   ;;  %v1955_v48 = vld [vmem:[%s2526_s3 + $0x64] ss:$16 sps:$4 sm:$0xff]  }
  0x63   :  { %1145 = vmatpush1.bf16.msra.mxu0 %v1932_v35  ;;  %1106 = vmatpush1.bf16.msra.mxu1 %v1935_v38  ;;  %v1958_v49 = vld [vmem:[%s2526_s3 + $0x6c] ss:$16 sps:$4 sm:$0xff]   ;;  %v1953_v50 = vld [vmem:[%s2526_s3 + $0x60] ss:$16 sps:$4 sm:$0xff]   ;;  %v1956_v51 = vld [vmem:[%s2526_s3 + $0x68] ss:$16 sps:$4 sm:$0xff]  }
  0x64   :  { %1146 = vmatprep.subr.bf16.mxu0 %v1940_v37  ;;  %1107 = vmatprep.subr.bf16.mxu1 %v1943_v40  ;;  %v1961_v52 = vld [vmem:[%s2526_s3 + $0x44] ss:$16 sps:$4 sm:$0xff]   ;;  %v1964_v53 = vld [vmem:[%s2526_s3 + $0x4c] ss:$16 sps:$4 sm:$0xff]   ;;  %v1959_v54 = vld [vmem:[%s2526_s3 + $0x40] ss:$16 sps:$4 sm:$0xff]  }
  0x65   :  { %v1962_v55 = vld [vmem:[%s2526_s3 + $0x48] ss:$16 sps:$4 sm:$0xff]   ;;  %v1967_v56 = vld [vmem:[%s2526_s3 + $0x24] ss:$16 sps:$4 sm:$0xff]   ;;  %v1970_v57 = vld [vmem:[%s2526_s3 + $0x2c] ss:$16 sps:$4 sm:$0xff]  }
  0x66   :  { %v1965_v58 = vld [vmem:[%s2526_s3 + $0x20] ss:$16 sps:$4 sm:$0xff]   ;;  %v1968_v59 = vld [vmem:[%s2526_s3 + $0x28] ss:$16 sps:$4 sm:$0xff]   ;;  %v1973_v60 = vld [vmem:[%s2526_s3 + $0x4] ss:$16 sps:$4 sm:$0xff]  }
  0x67   :  { %1147 = vmatpush1.bf16.msra.mxu0 %v1938_v39  ;;  %1108 = vmatpush1.bf16.msra.mxu1 %v1941_v42  ;;  %v1976_v61 = vld [vmem:[%s2526_s3 + $0xc] ss:$16 sps:$4 sm:$0xff]   ;;  %v1971_v62 = vld [vmem:[%s2526_s3] ss:$16 sps:$4 sm:$0xff]   ;;  %v1974_v63 = vld [vmem:[%s2526_s3 + $0x8] ss:$16 sps:$4 sm:$0xff]  }
  0x68   :  { %1148 = vmatprep.subr.bf16.mxu0 %v1946_v41  ;;  %1109 = vmatprep.subr.bf16.mxu1 %v1949_v44  ;;  %v2034_v0 = vmov 0   ;;  %v1977_v1 = vld [vmem:[%s2528_s5 + $0x78] sm:$0xff]   ;;  %v1551_v20 = vld [vmem:[%s2525_s2] ss:$0 sm:$0xff]  ;;  %v1981_v37 = vld [vmem:[%s2528_s5 + $0x70] sm:$0xff]   ;;  %s2035_s12 = smov [#allocation2]  }
  0x69   :  { %1135 = vmatprep.mubr.bf16.mxu1 %v2034_v0  ;;  %1176 = vmatprep.mubr.bf16.mxu0 %v2034_v0  ;;  %v1978_v2 = vld [vmem:[%s2528_s5 + $0xf8] sm:$0xff]   ;;  %v1982_v38 = vld [vmem:[%s2528_s5 + $0xf0] sm:$0xff]   ;;  %v1985_v42 = vld [vmem:[%s2528_s5 + $0x68] sm:$0xff]   ;;  %s1543_s13 = sshll.u32 %s2035_s12, 4  ;;  %s1544_s13 = int_to_ptr.vmem [resolvable:$true] %s1543_s13 }
  0x6a   :  { %v1979_v34 = vld [vmem:[%s2528_s5 + $0x38] sm:$0xff]   ;;  %v1983_v40 = vld [vmem:[%s2528_s5 + $0x30] sm:$0xff]   ;;  %v1987_v44 = vld [vmem:[%s2528_s5 + $0x28] sm:$0xff]   ;;  %s2009_s14 = scalar_lea.vmem %s1544_s13, 32  ;;  %p2014_p1 = scmp.lt.s32.totalorder %s1544_s13, %s1544_s13 }
  0x6b   :  { %1149 = vmatpush1.bf16.msra.mxu0 %v1944_v43  ;;  %1110 = vmatpush1.bf16.msra.mxu1 %v1947_v46  ;;  %v1980_v35 = vld [vmem:[%s2528_s5 + $0xb8] sm:$0xff]   ;;  %v1984_v41 = vld [vmem:[%s2528_s5 + $0xb0] sm:$0xff]   ;;  %v1986_v43 = vld [vmem:[%s2528_s5 + $0xe8] sm:$0xff]   ;;  %p2010_p0 = scmp.ne.s32.totalorder %s1544_s13, %s2009_s14  ;;  %p2015_p2 = scmp.lt.s32.totalorder %s2009_s14, %s2009_s14 }
  0x6c   :  { %1150 = vmatprep.subr.bf16.mxu0 %v1952_v45  ;;  %1111 = vmatprep.subr.bf16.mxu1 %v1955_v48  ;;  %v1988_v45 = vld [vmem:[%s2528_s5 + $0xa8] sm:$0xff]   ;;  %v1989_v46 = vld [vmem:[%s2528_s5 + $0x60] sm:$0xff]  }
  0x6d   :  { %v1991_v48 = vld [vmem:[%s2528_s5 + $0x20] sm:$0xff]   ;;  %p2016_p3 = por %p2015_p2, %p2014_p1 }
  0x6e   :  { %v2007_v0 = vld [vmem:[%s2528_s5] sm:$0xff]  }
  0x6f   :  { %1151 = vmatpush1.bf16.msra.mxu0 %v1950_v47  ;;  %1112 = vmatpush1.bf16.msra.mxu1 %v1953_v50  ;;  %v1990_v47 = vld [vmem:[%s2528_s5 + $0xe0] sm:$0xff]   ;;  %v1993_v50 = vld [vmem:[%s2528_s5 + $0x58] sm:$0xff]   ;;  %p2017_p4 = pnand %p2016_p3, %p2010_p0 }
  0x70   :  { %1152 = vmatprep.subr.bf16.mxu0 %v1958_v49  ;;  %1113 = vmatprep.subr.bf16.mxu1 %v1961_v52  ;;  %v1992_v49 = vld [vmem:[%s2528_s5 + $0xa0] sm:$0xff]   ;;  %v1995_v52 = vld [vmem:[%s2528_s5 + $0x18] sm:$0xff]  }
  0x73   :  { %1153 = vmatpush1.bf16.msra.mxu0 %v1956_v51  ;;  %1114 = vmatpush1.bf16.msra.mxu1 %v1959_v54  ;;  %v1994_v51 = vld [vmem:[%s2528_s5 + $0xd8] sm:$0xff]   ;;  %v1997_v54 = vld [vmem:[%s2528_s5 + $0x50] sm:$0xff]  }
  0x74   :  { %1154 = vmatprep.subr.bf16.mxu0 %v1964_v53  ;;  %1115 = vmatprep.subr.bf16.mxu1 %v1967_v56  ;;  %v1996_v53 = vld [vmem:[%s2528_s5 + $0x98] sm:$0xff]   ;;  %v1999_v56 = vld [vmem:[%s2528_s5 + $0x10] sm:$0xff]  }
  0x77   :  { %1155 = vmatpush1.bf16.msra.mxu0 %v1962_v55  ;;  %1116 = vmatpush1.bf16.msra.mxu1 %v1965_v58  ;;  %v1998_v55 = vld [vmem:[%s2528_s5 + $0xd0] sm:$0xff]   ;;  %v2001_v58 = vld [vmem:[%s2528_s5 + $0x48] sm:$0xff]  }
  0x78   :  { %1156 = vmatprep.subr.bf16.mxu0 %v1970_v57  ;;  %1117 = vmatprep.subr.bf16.mxu1 %v1973_v60  ;;  %v2000_v57 = vld [vmem:[%s2528_s5 + $0x90] sm:$0xff]   ;;  %v2003_v60 = vld [vmem:[%s2528_s5 + $0x8] sm:$0xff]  }
  0x7b   :  { %1157 = vmatpush1.bf16.msra.mxu0 %v1968_v59  ;;  %1118 = vmatpush1.bf16.msra.mxu1 %v1971_v62  ;;  %v2002_v59 = vld [vmem:[%s2528_s5 + $0xc8] sm:$0xff]   ;;  %v2005_v62 = vld [vmem:[%s2528_s5 + $0x40] sm:$0xff]  }
  0x7c   :  { %1158 = vmatprep.subr.bf16.mxu0 %v1976_v61  ;;  %1787 = vmatprep.subr.bf16.mxu1 %v1977_v1  ;;  %v2004_v61 = vld [vmem:[%s2528_s5 + $0x88] sm:$0xff]   ;;  %v2008_v1 = vld [vmem:[%s2528_s5 + $0x80] sm:$0xff]  }
  0x7f   :  { %1159 = vmatpush1.bf16.msra.mxu0 %v1974_v63  ;;  %v2006_v63 = vld [vmem:[%s2528_s5 + $0xc0] sm:$0xff]  }
  0x80   :  { %1809 = vmatprep.subr.bf16.mxu0 %v1978_v2  ;;  %v925_v2 = vsub.s32 0, %v2169_v32 }
  0xe2   :  { %v1706_v3 = vpop.f32.mrf.mxu0 }
  0xe4   :  { %v1707_v4 = vpop.f32.mrf.mxu0  ;;  %v1728_v5 = vpop.f32.mrf.mxu1 }
  0xe5   :  { %v1708_v19 = vadd.f32 %v1707_v4, %v1706_v3  ;;  %v933_v3 = vsub.s32 2, %v2169_v32  ;;  %v921_v4 = vld [vmem:[%s2527_s4] sm:$0xf] }
  0xe6   :  { %v1709_v6 = vpop.f32.mrf.mxu0  ;;  %v1729_v7 = vpop.f32.mrf.mxu1 }
  0xe7   :  { %v722_v21 = vadd.f32 %v1708_v19, %v1551_v20  ;;  %v1730_v22 = vadd.f32 %v1729_v7, %v1728_v5  ;;  %v929_v5 = vsub.s32 1, %v2169_v32  ;;  %v937_v6 = vsub.s32 3, %v2169_v32 }
  0xe8   :  { %v1710_v8 = vpop.f32.mrf.mxu0  ;;  %v1731_v9 = vpop.f32.mrf.mxu1  ;;  %v926_v7 = vrot.slane %v921_v4, %v925_v2 }
  0xe9   :  { %v762_v24 = vadd.f32 %v1730_v22, %v722_v21  ;;  %v934_v8 = vrot.slane %v921_v4, %v933_v3  ;;  %v930_v9 = vrot.slane %v921_v4, %v929_v5 }
  0xea   :  { %v1732_v10 = vpop.f32.mrf.mxu1 }
  0xeb   :  { %v938_v10 = vrot.slane %v921_v4, %v937_v6 }
 0x102   :  { %v1750_v11 = vpop.f32.mrf.mxu0 }
 0x104   :  { %v1751_v12 = vpop.f32.mrf.mxu0  ;;  %v1772_v13 = vpop.f32.mrf.mxu1 }
 0x105   :  { %v1752_v23 = vadd.f32 %v1751_v12, %v1750_v11 }
 0x106   :  { %v1753_v14 = vpop.f32.mrf.mxu0  ;;  %v1773_v15 = vpop.f32.mrf.mxu1 }
 0x107   :  { %v802_v25 = vadd.f32 %v1752_v23, %v762_v24  ;;  %v1774_v26 = vadd.f32 %v1773_v15, %v1772_v13 }
 0x108   :  { %v1754_v16 = vpop.f32.mrf.mxu0  ;;  %v1775_v17 = vpop.f32.mrf.mxu1 }
 0x109   :  { %v842_v27 = vadd.f32 %v1774_v26, %v802_v25 }
 0x10a   :  { %v1776_v18 = vpop.f32.mrf.mxu1 }
 0x122   :  { %v881_v28 = vpop.f32.mrf.mxu0 }
 0x123   :  { %v882_v29 = vadd.f32 %v881_v28, %v842_v27 }
 0x124   :  { %v1849_v30 = vpop.f32.mrf.mxu0 }
 0x125   :  { %v887_v31 = vmax.f32 %v882_v29, 0.0 }
 0x126   :  { %v884_v33 = vpop.f32.mrf.mxu0 }
 0x127   :  { %v888_v36 = vpack.c.bf16 %v887_v31, %v887_v31  ;;  %v1657_v33 = vld [vmem:[%s2529_s6] ss:$0 sm:$0xff] }
 0x128   :  { %v1850_v39 = vpop.f32.mrf.mxu0 }
 0x129   :  { %1136 = vmatmul.mubr.bf16.vlgmr.msra.gmra.mxu1 %v888_v36  ;;  %1177 = vmatmul.mubr.bf16.vlgmr.msra.gmra.mxu0 %v888_v36 }
 0x12a   :  { %1788 = vmatpush3.bf16.msra.mxu1 %v1979_v34  ;;  %1810 = vmatpush3.bf16.msra.mxu0 %v1980_v35 }
 0x12b   :  { %1789 = vmatprep.subr.bf16.mxu1 %v1981_v37  ;;  %1811 = vmatprep.subr.bf16.mxu0 %v1982_v38 }
 0x12e   :  { %1790 = vmatpush3.bf16.msra.mxu1 %v1983_v40  ;;  %1812 = vmatpush3.bf16.msra.mxu0 %v1984_v41 }
 0x12f   :  { %1791 = vmatprep.subr.bf16.mxu1 %v1985_v42  ;;  %1813 = vmatprep.subr.bf16.mxu0 %v1986_v43 }
 0x132   :  { %1792 = vmatpush3.bf16.msra.mxu1 %v1987_v44  ;;  %1814 = vmatpush3.bf16.msra.mxu0 %v1988_v45 }
 0x133   :  { %1793 = vmatprep.subr.bf16.mxu1 %v1989_v46  ;;  %1815 = vmatprep.subr.bf16.mxu0 %v1990_v47 }
 0x136   :  { %1794 = vmatpush3.bf16.msra.mxu1 %v1991_v48  ;;  %1816 = vmatpush3.bf16.msra.mxu0 %v1992_v49 }
 0x137   :  { %1795 = vmatprep.subr.bf16.mxu1 %v1993_v50  ;;  %1817 = vmatprep.subr.bf16.mxu0 %v1994_v51 }
 0x13a   :  { %1796 = vmatpush3.bf16.msra.mxu1 %v1995_v52  ;;  %1818 = vmatpush3.bf16.msra.mxu0 %v1996_v53 }
 0x13b   :  { %1797 = vmatprep.subr.bf16.mxu1 %v1997_v54  ;;  %1819 = vmatprep.subr.bf16.mxu0 %v1998_v55 }
 0x13e   :  { %1798 = vmatpush3.bf16.msra.mxu1 %v1999_v56  ;;  %1820 = vmatpush3.bf16.msra.mxu0 %v2000_v57 }
 0x13f   :  { %1799 = vmatprep.subr.bf16.mxu1 %v2001_v58  ;;  %1821 = vmatprep.subr.bf16.mxu0 %v2002_v59 }
 0x142   :  { %1800 = vmatpush3.bf16.msra.mxu1 %v2003_v60  ;;  %1822 = vmatpush3.bf16.msra.mxu0 %v2004_v61 }
 0x143   :  { %1801 = vmatprep.subr.bf16.mxu1 %v2005_v62  ;;  %1823 = vmatprep.subr.bf16.mxu0 %v2006_v63 }
 0x146   :  { %1802 = vmatpush3.bf16.msra.mxu1 %v2007_v0  ;;  %1824 = vmatpush3.bf16.msra.mxu0 %v2008_v1 }
 0x1e9   :  { %v1137_v11 = vpop.f32.mrf.mxu1  ;;  %v1178_v12 = vpop.f32.mrf.mxu0 }
 0x1ea   :  { %v1138_v13 = vadd.f32 %v1137_v11, %v926_v7  ;;  %v1179_v14 = vadd.f32 %v1178_v12, %v934_v8 }
 0x1eb   :  { %v1139_v15 = vpop.f32.mrf.mxu1  ;;  %v1180_v16 = vpop.f32.mrf.mxu0 }
 0x1ec   :  { %v1140_v17 = vadd.f32 %v1139_v15, %v930_v9  ;;  %v1181_v18 = vadd.f32 %v1180_v16, %v938_v10  ;;  %v1185_v19 = vmax.f32 %v1138_v13, 0.0  ;;  %v1187_v20 = vmax.f32 %v1179_v14, 0.0 }
 0x1ed   :  { %v1141_v21 = vpop.f32.mrf.mxu1  ;;  %v1182_v22 = vpop.f32.mrf.mxu0 }
 0x1ee   :  { %v1186_v23 = vmax.f32 %v1140_v17, 0.0  ;;  %v1188_v24 = vmax.f32 %v1181_v18, 0.0  ;;  %v1189_v28 = vpack.c.bf16 %v1185_v19, %v1185_v19  ;;  %v1191_v29 = vpack.c.bf16 %v1187_v20, %v1187_v20 }
 0x1ef   :  { %v1142_v25 = vpop.f32.mrf.mxu1  ;;  %v1183_v32 = vpop.f32.mrf.mxu0 }
 0x1f0   :  { %v1190_v26 = vpack.c.bf16 %v1186_v23, %v1186_v23  ;;  %v1192_v27 = vpack.c.bf16 %v1188_v24, %v1188_v24 }
 0x1f2   :  { %1488 = vmatprep.mubr.bf16.mxu1 %v1190_v26  ;;  %1528 = vmatprep.mubr.bf16.mxu0 %v1192_v27 }
 0x1f3   :  { %1489 = vmatmul.mubr.bf16.vlgmr.msra.gmra.mxu1 %v1189_v28  ;;  %1529 = vmatmul.mubr.bf16.vlgmr.msra.gmra.mxu0 %v1191_v29 }
 0x2b3   :  { %v1803_v30 = vpop.f32.mrf.mxu1  ;;  %v1825_v31 = vpop.f32.mrf.mxu0 }
 0x2b5   :  { %v1804_v34 = vpop.f32.mrf.mxu1  ;;  %v1826_v35 = vpop.f32.mrf.mxu0 }
 0x2b6   :  { %v1805_v36 = vadd.f32 %v1804_v34, %v1803_v30  ;;  %v1827_v40 = vadd.f32 %v1826_v35, %v1825_v31 }
 0x2b7   :  { %v1806_v37 = vpop.f32.mrf.mxu1  ;;  %v1828_v38 = vpop.f32.mrf.mxu0 }
 0x2b8   :  { %v1491_v39 = vadd.f32 %v1805_v36, %v1657_v33 }
 0x2b9   :  { %v1807_v41 = vpop.f32.mrf.mxu1  ;;  %v1829_v42 = vpop.f32.mrf.mxu0 }
 0x2ba   :  { %v1531_v43 = vadd.f32 %v1827_v40, %v1491_v39 }
 0x2bc   :  { %1536 = vst [vmem:[#allocation2] sm:$0x3] %v1531_v43 }
 0x2bd   :  { %2020 = shalt.err (!%p2017_p4)
}
 0x2be   :  { %1546 = dma.vmem_to_hbm [thread:$0]  %s1544_s13, 32, %s2530_s7, [#allocation3]  }
 0x2bf   :  { %2029 = dma.done.wait [#allocation3], 32  }
 0x2c0   :  { %2030 = vsyncadd [#allocation3], 4294967264 }
 0x2c1   :  { %1550 = vsyncpa [#allocation3], 1 }

// kernel: dqn_forward.4
= control target key start
LH: loop header
LB: loop body
LE: loop exit
PB: predicated region body
PF: predicated region fallthrough
CT: control target
= control target key end

     0   :  { %s2638_s1 = inlined_call_operand.vmem [shape: bf16[2048,128], index: 1, kind: input, shape index: {}]   ;;  %s2639_s0 = inlined_call_operand.vmem [shape: bf16[18,2048], index: 0, kind: input, shape index: {}]   ;;  %s2640_s2 = inlined_call_operand.vmem [shape: f32[1,128], index: 2, kind: input, shape index: {}]   ;;  %s2641_s3 = inlined_call_operand.vmem [shape: bf16[18,128], index: 3, kind: output, shape index: {}]  }
   0x1   :  { %v2009_v0 = vld [vmem:[%s2638_s1 + $0x78] sm:$0xff]   ;;  %v2013_v4 = vld [vmem:[%s2638_s1 + $0x70] sm:$0xff]   ;;  %v2017_v8 = vld [vmem:[%s2638_s1 + $0x68] sm:$0xff]  }
   0x2   :  { %v2010_v1 = vld [vmem:[%s2638_s1 + $0xf8] sm:$0xff]   ;;  %1785 = vmatprep.subr.bf16.mxu0 %v2009_v0  ;;  %v2014_v5 = vld [vmem:[%s2638_s1 + $0xf0] sm:$0xff]   ;;  %v2018_v9 = vld [vmem:[%s2638_s1 + $0xe8] sm:$0xff]  }
   0x3   :  { %v2011_v2 = vld [vmem:[%s2638_s1 + $0x38] sm:$0xff]   ;;  %1813 = vmatprep.subr.bf16.mxu1 %v2010_v1  ;;  %v2015_v6 = vld [vmem:[%s2638_s1 + $0x30] sm:$0xff]   ;;  %v2019_v10 = vld [vmem:[%s2638_s1 + $0x28] sm:$0xff]  }
   0x4   :  { %v2012_v3 = vld [vmem:[%s2638_s1 + $0xb8] sm:$0xff]   ;;  %1786 = vmatpush3.bf16.msra.mxu0 %v2011_v2  ;;  %v2016_v7 = vld [vmem:[%s2638_s1 + $0xb0] sm:$0xff]   ;;  %v2020_v11 = vld [vmem:[%s2638_s1 + $0xa8] sm:$0xff]  }
   0x5   :  { %1814 = vmatpush3.bf16.msra.mxu1 %v2012_v3  ;;  %1787 = vmatprep.subr.bf16.mxu0 %v2013_v4  ;;  %v2021_v12 = vld [vmem:[%s2638_s1 + $0x60] sm:$0xff]   ;;  %v2025_v16 = vld [vmem:[%s2638_s1 + $0x58] sm:$0xff]   ;;  %v2029_v20 = vld [vmem:[%s2638_s1 + $0x50] sm:$0xff]  }
   0x6   :  { %1815 = vmatprep.subr.bf16.mxu1 %v2014_v5  ;;  %v2022_v13 = vld [vmem:[%s2638_s1 + $0xe0] sm:$0xff]   ;;  %v2026_v17 = vld [vmem:[%s2638_s1 + $0xd8] sm:$0xff]   ;;  %v2030_v21 = vld [vmem:[%s2638_s1 + $0xd0] sm:$0xff]  }
   0x7   :  { %v2023_v14 = vld [vmem:[%s2638_s1 + $0x20] sm:$0xff]   ;;  %v2027_v18 = vld [vmem:[%s2638_s1 + $0x18] sm:$0xff]   ;;  %v2031_v22 = vld [vmem:[%s2638_s1 + $0x10] sm:$0xff]  }
   0x8   :  { %1788 = vmatpush3.bf16.msra.mxu0 %v2015_v6  ;;  %v2024_v15 = vld [vmem:[%s2638_s1 + $0xa0] sm:$0xff]   ;;  %v2028_v19 = vld [vmem:[%s2638_s1 + $0x98] sm:$0xff]   ;;  %v2032_v23 = vld [vmem:[%s2638_s1 + $0x90] sm:$0xff]  }
   0x9   :  { %1816 = vmatpush3.bf16.msra.mxu1 %v2016_v7  ;;  %1789 = vmatprep.subr.bf16.mxu0 %v2017_v8  ;;  %v2033_v24 = vld [vmem:[%s2638_s1 + $0x48] sm:$0xff]   ;;  %v2037_v28 = vld [vmem:[%s2638_s1 + $0x40] sm:$0xff]   ;;  %v2041_v40 = vld [vmem:[%s2638_s1 + $0x178] sm:$0xff]  }
   0xa   :  { %1817 = vmatprep.subr.bf16.mxu1 %v2018_v9  ;;  %v2034_v25 = vld [vmem:[%s2638_s1 + $0xc8] sm:$0xff]   ;;  %v2038_v29 = vld [vmem:[%s2638_s1 + $0xc0] sm:$0xff]   ;;  %v2042_v41 = vld [vmem:[%s2638_s1 + $0x1f8] sm:$0xff]  }
   0xb   :  { %v2035_v26 = vld [vmem:[%s2638_s1 + $0x8] sm:$0xff]   ;;  %v2039_v30 = vld [vmem:[%s2638_s1] sm:$0xff]   ;;  %v2043_v42 = vld [vmem:[%s2638_s1 + $0x138] sm:$0xff]  }
   0xc   :  { %1790 = vmatpush3.bf16.msra.mxu0 %v2019_v10  ;;  %v2036_v27 = vld [vmem:[%s2638_s1 + $0x88] sm:$0xff]   ;;  %v2040_v31 = vld [vmem:[%s2638_s1 + $0x80] sm:$0xff]   ;;  %v2044_v43 = vld [vmem:[%s2638_s1 + $0x1b8] sm:$0xff]  }
   0xd   :  { %1818 = vmatpush3.bf16.msra.mxu1 %v2020_v11  ;;  %1791 = vmatprep.subr.bf16.mxu0 %v2021_v12  ;;  %v15_v32 = vld [vmem:[%s2639_s0] sm:$0xff]  ;;  %v16_v34 = vld [vmem:[%s2639_s0 + $0x8] sm:$0xff]  ;;  %v2045_v44 = vld [vmem:[%s2638_s1 + $0x170] sm:$0xff]  }
   0xe   :  { %1819 = vmatprep.subr.bf16.mxu1 %v2022_v13  ;;  %v23_v33 = vld [vmem:[%s2639_s0 + $0x40] sm:$0xff]  ;;  %v24_v37 = vld [vmem:[%s2639_s0 + $0x48] sm:$0xff]  ;;  %v2046_v45 = vld [vmem:[%s2638_s1 + $0x1f0] sm:$0xff]  }
   0xf   :  { %v1614_v35 = vcombine.low %v15_v32, %v23_v33  ;;  %v1615_v36 = vcombine.high %v15_v32, %v23_v33  ;;  %v1616_v38 = vcombine.low %v16_v34, %v24_v37  ;;  %v1617_v39 = vcombine.high %v16_v34, %v24_v37  ;;  %v2047_v46 = vld [vmem:[%s2638_s1 + $0x130] sm:$0xff]   ;;  %v2049_v48 = vld [vmem:[%s2638_s1 + $0x168] sm:$0xff]   ;;  %v2053_v52 = vld [vmem:[%s2638_s1 + $0x160] sm:$0xff]  }
  0x10   :  { %1792 = vmatpush3.bf16.msra.mxu0 %v2023_v14  ;;  %v2048_v47 = vld [vmem:[%s2638_s1 + $0x1b0] sm:$0xff]   ;;  %v2050_v49 = vld [vmem:[%s2638_s1 + $0x1e8] sm:$0xff]   ;;  %v2054_v53 = vld [vmem:[%s2638_s1 + $0x1e0] sm:$0xff]  }
  0x11   :  { %1820 = vmatpush3.bf16.msra.mxu1 %v2024_v15  ;;  %1793 = vmatprep.subr.bf16.mxu0 %v2025_v16  ;;  %v2051_v50 = vld [vmem:[%s2638_s1 + $0x128] sm:$0xff]   ;;  %v2055_v54 = vld [vmem:[%s2638_s1 + $0x120] sm:$0xff]   ;;  %v2057_v56 = vld [vmem:[%s2638_s1 + $0x158] sm:$0xff]  }
  0x12   :  { %1821 = vmatprep.subr.bf16.mxu1 %v2026_v17  ;;  %1238 = vmatprep.mubr.bf16.mxu0 %v1615_v36  ;;  %v2052_v51 = vld [vmem:[%s2638_s1 + $0x1a8] sm:$0xff]   ;;  %v2056_v55 = vld [vmem:[%s2638_s1 + $0x1a0] sm:$0xff]   ;;  %v2058_v57 = vld [vmem:[%s2638_s1 + $0x1d8] sm:$0xff]  }
  0x13   :  { %1286 = vmatprep.mubr.bf16.mxu1 %v1617_v39  ;;  %v2059_v58 = vld [vmem:[%s2638_s1 + $0x118] sm:$0xff]   ;;  %v31_v60 = vld [vmem:[%s2639_s0 + $0x80] sm:$0x11]  ;;  %v32_v61 = vld [vmem:[%s2639_s0 + $0x88] sm:$0x11] }
  0x14   :  { %1794 = vmatpush3.bf16.msra.mxu0 %v2027_v18  ;;  %v2060_v59 = vld [vmem:[%s2638_s1 + $0x198] sm:$0xff]   ;;  %v1631_v62 = vcombine.high %v31_v60, %v31_v60  ;;  %v1630_v63 = vcombine.low %v31_v60, %v31_v60  ;;  %v1633_v0 = vcombine.high %v32_v61, %v32_v61  ;;  %v2064_v1 = vld [vmem:[%s2638_s1 + $0x150] sm:$0xff]   ;;  %v1632_v2 = vcombine.low %v32_v61, %v32_v61  ;;  %v2069_v6 = vld [vmem:[%s2638_s1 + $0x148] sm:$0xff]  }
  0x15   :  { %1822 = vmatpush3.bf16.msra.mxu1 %v2028_v19  ;;  %1795 = vmatprep.subr.bf16.mxu0 %v2029_v20  ;;  %v2065_v3 = vld [vmem:[%s2638_s1 + $0x1d0] sm:$0xff]   ;;  %v2070_v7 = vld [vmem:[%s2638_s1 + $0x1c8] sm:$0xff]   ;;  %v2073_v10 = vld [vmem:[%s2638_s1 + $0x140] sm:$0xff]  }
  0x16   :  { %1823 = vmatprep.subr.bf16.mxu1 %v2030_v21  ;;  %v2067_v4 = vld [vmem:[%s2638_s1 + $0x110] sm:$0xff]   ;;  %v2071_v8 = vld [vmem:[%s2638_s1 + $0x108] sm:$0xff]   ;;  %v2074_v11 = vld [vmem:[%s2638_s1 + $0x1c0] sm:$0xff]  }
  0x17   :  { %v2068_v5 = vld [vmem:[%s2638_s1 + $0x190] sm:$0xff]   ;;  %v2072_v9 = vld [vmem:[%s2638_s1 + $0x188] sm:$0xff]   ;;  %v2075_v12 = vld [vmem:[%s2638_s1 + $0x100] sm:$0xff]  }
  0x18   :  { %1796 = vmatpush3.bf16.msra.mxu0 %v2031_v22  ;;  %v2076_v13 = vld [vmem:[%s2638_s1 + $0x180] sm:$0xff]   ;;  %v17_v14 = vld [vmem:[%s2639_s0 + $0x10] sm:$0xff]  ;;  %v18_v16 = vld [vmem:[%s2639_s0 + $0x18] sm:$0xff] }
  0x19   :  { %1824 = vmatpush3.bf16.msra.mxu1 %v2032_v23  ;;  %1797 = vmatprep.subr.bf16.mxu0 %v2033_v24  ;;  %v25_v15 = vld [vmem:[%s2639_s0 + $0x50] sm:$0xff]  ;;  %v26_v19 = vld [vmem:[%s2639_s0 + $0x58] sm:$0xff]  ;;  %v2087_v33 = vld [vmem:[%s2638_s1 + $0x268] sm:$0xff]  }
  0x1a   :  { %1825 = vmatprep.subr.bf16.mxu1 %v2034_v25  ;;  %v1618_v17 = vcombine.low %v17_v14, %v25_v15  ;;  %v1619_v18 = vcombine.high %v17_v14, %v25_v15  ;;  %v1620_v20 = vcombine.low %v18_v16, %v26_v19  ;;  %v1621_v21 = vcombine.high %v18_v16, %v26_v19  ;;  %v2077_v22 = vld [vmem:[%s2638_s1 + $0x278] sm:$0xff]   ;;  %v2088_v34 = vld [vmem:[%s2638_s1 + $0x2e8] sm:$0xff]   ;;  %v19_v60 = vld [vmem:[%s2639_s0 + $0x20] sm:$0xff] }
  0x1b   :  { %v2078_v23 = vld [vmem:[%s2638_s1 + $0x2f8] sm:$0xff]   ;;  %v2090_v37 = vld [vmem:[%s2638_s1 + $0x228] sm:$0xff]   ;;  %v27_v61 = vld [vmem:[%s2639_s0 + $0x60] sm:$0xff] }
  0x1c   :  { %1798 = vmatpush3.bf16.msra.mxu0 %v2035_v26  ;;  %v2079_v24 = vld [vmem:[%s2638_s1 + $0x238] sm:$0xff]   ;;  %v2081_v26 = vld [vmem:[%s2638_s1 + $0x270] sm:$0xff]   ;;  %v2091_v39 = vld [vmem:[%s2638_s1 + $0x2a8] sm:$0xff]  }
  0x1d   :  { %1826 = vmatpush3.bf16.msra.mxu1 %v2036_v27  ;;  %1799 = vmatprep.subr.bf16.mxu0 %v2037_v28  ;;  %v2080_v25 = vld [vmem:[%s2638_s1 + $0x2b8] sm:$0xff]   ;;  %v2082_v27 = vld [vmem:[%s2638_s1 + $0x2f0] sm:$0xff]   ;;  %v2123_v15 = vld [vmem:[%s2638_s1 + $0x368] sm:$0xff]  }
  0x1e   :  { %1827 = vmatprep.subr.bf16.mxu1 %v2038_v29  ;;  %v2083_v28 = vld [vmem:[%s2638_s1 + $0x230] sm:$0xff]   ;;  %v2124_v16 = vld [vmem:[%s2638_s1 + $0x3e8] sm:$0xff]  }
  0x1f   :  { %v2084_v29 = vld [vmem:[%s2638_s1 + $0x2b0] sm:$0xff]   ;;  %v2126_v19 = vld [vmem:[%s2638_s1 + $0x328] sm:$0xff]  }
  0x20   :  { %1800 = vmatpush3.bf16.msra.mxu0 %v2039_v30  ;;  %v33_v30 = vld [vmem:[%s2639_s0 + $0x90] sm:$0x11] }
  0x21   :  { %1828 = vmatpush3.bf16.msra.mxu1 %v2040_v31  ;;  %1841 = vmatprep.subr.bf16.mxu0 %v2041_v40  ;;  %v1635_v31 = vcombine.high %v33_v30, %v33_v30  ;;  %v1634_v32 = vcombine.low %v33_v30, %v33_v30  ;;  %v2093_v40 = vld [vmem:[%s2638_s1 + $0x260] sm:$0xff]   ;;  %v2137_v30 = vld [vmem:[%s2638_s1 + $0x350] sm:$0xff]  }
  0x22   :  { %1869 = vmatprep.subr.bf16.mxu1 %v2042_v41  ;;  %v2094_v41 = vld [vmem:[%s2638_s1 + $0x2e0] sm:$0xff]  }
  0x23   :  { %1239 = vmatmul.mubr.bf16.vlgmr.msra.gmra.mxu0 %v1614_v35  ;;  %v34_v35 = vld [vmem:[%s2639_s0 + $0x98] sm:$0x11] }
  0x24   :  { %1287 = vmatmul.mubr.bf16.vlgmr.msra.gmra.mxu1 %v1616_v38  ;;  %1842 = vmatpush3.bf16.msra.mxu0 %v2043_v42  ;;  %v1637_v36 = vcombine.high %v34_v35, %v34_v35  ;;  %v1636_v38 = vcombine.low %v34_v35, %v34_v35  ;;  %v2095_v42 = vld [vmem:[%s2638_s1 + $0x220] sm:$0xff]   ;;  %v2142_v35 = vld [vmem:[%s2638_s1 + $0x3c8] sm:$0xff]  }
  0x25   :  { %1870 = vmatpush3.bf16.msra.mxu1 %v2044_v43  ;;  %1843 = vmatprep.subr.bf16.mxu0 %v2045_v44  ;;  %v2096_v43 = vld [vmem:[%s2638_s1 + $0x2a0] sm:$0xff]   ;;  %v2097_v44 = vld [vmem:[%s2638_s1 + $0x258] sm:$0xff]  }
  0x26   :  { %1871 = vmatprep.subr.bf16.mxu1 %v2046_v45  ;;  %1246 = vmatprep.mubr.bf16.mxu0 %v1631_v62  ;;  %v2098_v45 = vld [vmem:[%s2638_s1 + $0x2d8] sm:$0xff]   ;;  %v20_v62 = vld [vmem:[%s2639_s0 + $0x28] sm:$0xff] }
  0x27   :  { %1294 = vmatprep.mubr.bf16.mxu1 %v1633_v0  ;;  %v1623_v0 = vcombine.high %v19_v60, %v27_v61 }
  0x28   :  { %1844 = vmatpush3.bf16.msra.mxu0 %v2047_v46  ;;  %v2099_v46 = vld [vmem:[%s2638_s1 + $0x218] sm:$0xff]  }
  0x29   :  { %1872 = vmatpush3.bf16.msra.mxu1 %v2048_v47  ;;  %1845 = vmatprep.subr.bf16.mxu0 %v2049_v48  ;;  %v2100_v47 = vld [vmem:[%s2638_s1 + $0x298] sm:$0xff]   ;;  %v2101_v48 = vld [vmem:[%s2638_s1 + $0x250] sm:$0xff]  }
  0x2a   :  { %1873 = vmatprep.subr.bf16.mxu1 %v2050_v49  ;;  %v2102_v49 = vld [vmem:[%s2638_s1 + $0x2d0] sm:$0xff]  }
  0x2b   :  { %1247 = vmatmul.mubr.bf16.gmra.mxu0 %v1630_v63  ;;  %v1622_v63 = vcombine.low %v19_v60, %v27_v61 }
  0x2c   :  { %1846 = vmatpush3.bf16.msra.mxu0 %v2051_v50  ;;  %1295 = vmatmul.mubr.bf16.gmra.mxu1 %v1632_v2  ;;  %v2103_v50 = vld [vmem:[%s2638_s1 + $0x210] sm:$0xff]  }
  0x2d   :  { %1874 = vmatpush3.bf16.msra.mxu1 %v2052_v51  ;;  %1847 = vmatprep.subr.bf16.mxu0 %v2053_v52  ;;  %v2104_v51 = vld [vmem:[%s2638_s1 + $0x290] sm:$0xff]   ;;  %v2105_v52 = vld [vmem:[%s2638_s1 + $0x248] sm:$0xff]  }
  0x2e   :  { %1875 = vmatprep.subr.bf16.mxu1 %v2054_v53  ;;  %1334 = vmatprep.mubr.bf16.mxu0 %v1619_v18  ;;  %v2106_v53 = vld [vmem:[%s2638_s1 + $0x2c8] sm:$0xff]  }
  0x2f   :  { %1382 = vmatprep.mubr.bf16.mxu1 %v1621_v21  ;;  %v2127_v21 = vld [vmem:[%s2638_s1 + $0x3a8] sm:$0xff]  }
  0x30   :  { %1848 = vmatpush3.bf16.msra.mxu0 %v2055_v54  ;;  %v2107_v54 = vld [vmem:[%s2638_s1 + $0x208] sm:$0xff]  }
  0x31   :  { %1876 = vmatpush3.bf16.msra.mxu1 %v2056_v55  ;;  %1849 = vmatprep.subr.bf16.mxu0 %v2057_v56  ;;  %v2108_v55 = vld [vmem:[%s2638_s1 + $0x288] sm:$0xff]   ;;  %v2109_v56 = vld [vmem:[%s2638_s1 + $0x240] sm:$0xff]  }
  0x32   :  { %1877 = vmatprep.subr.bf16.mxu1 %v2058_v57  ;;  %v2110_v57 = vld [vmem:[%s2638_s1 + $0x2c0] sm:$0xff]  }
  0x34   :  { %1850 = vmatpush3.bf16.msra.mxu0 %v2059_v58  ;;  %v2111_v58 = vld [vmem:[%s2638_s1 + $0x200] sm:$0xff]  }
  0x35   :  { %1878 = vmatpush3.bf16.msra.mxu1 %v2060_v59  ;;  %1851 = vmatprep.subr.bf16.mxu0 %v2064_v1  ;;  %v2112_v59 = vld [vmem:[%s2638_s1 + $0x280] sm:$0xff]   ;;  %v28_v1 = vld [vmem:[%s2639_s0 + $0x68] sm:$0xff] }
  0x36   :  { %1879 = vmatprep.subr.bf16.mxu1 %v2065_v3  ;;  %v1624_v2 = vcombine.low %v20_v62, %v28_v1  ;;  %v1625_v3 = vcombine.high %v20_v62, %v28_v1 }
  0x38   :  { %1852 = vmatpush3.bf16.msra.mxu0 %v2067_v4  ;;  %v2113_v4 = vld [vmem:[%s2638_s1 + $0x378] sm:$0xff]  }
  0x39   :  { %1880 = vmatpush3.bf16.msra.mxu1 %v2068_v5  ;;  %1853 = vmatprep.subr.bf16.mxu0 %v2069_v6  ;;  %v2114_v5 = vld [vmem:[%s2638_s1 + $0x3f8] sm:$0xff]  }
  0x3a   :  { %1881 = vmatprep.subr.bf16.mxu1 %v2070_v7  ;;  %v2115_v6 = vld [vmem:[%s2638_s1 + $0x338] sm:$0xff]  }
  0x3b   :  { %v2116_v7 = vld [vmem:[%s2638_s1 + $0x3b8] sm:$0xff]  }
  0x3c   :  { %1854 = vmatpush3.bf16.msra.mxu0 %v2071_v8  ;;  %v2117_v8 = vld [vmem:[%s2638_s1 + $0x370] sm:$0xff]  }
  0x3d   :  { %1882 = vmatpush3.bf16.msra.mxu1 %v2072_v9  ;;  %1855 = vmatprep.subr.bf16.mxu0 %v2073_v10  ;;  %v2118_v9 = vld [vmem:[%s2638_s1 + $0x3f0] sm:$0xff]  }
  0x3e   :  { %1883 = vmatprep.subr.bf16.mxu1 %v2074_v11  ;;  %v2119_v10 = vld [vmem:[%s2638_s1 + $0x330] sm:$0xff]  }
  0x3f   :  { %v2120_v11 = vld [vmem:[%s2638_s1 + $0x3b0] sm:$0xff]  }
  0x40   :  { %1856 = vmatpush3.bf16.msra.mxu0 %v2075_v12  ;;  %v35_v12 = vld [vmem:[%s2639_s0 + $0xa0] sm:$0x11] }
  0x41   :  { %1884 = vmatpush3.bf16.msra.mxu1 %v2076_v13  ;;  %1897 = vmatprep.subr.bf16.mxu0 %v2077_v22  ;;  %v1639_v13 = vcombine.high %v35_v12, %v35_v12  ;;  %v1638_v14 = vcombine.low %v35_v12, %v35_v12  ;;  %v2129_v22 = vld [vmem:[%s2638_s1 + $0x360] sm:$0xff]  }
  0x42   :  { %1925 = vmatprep.subr.bf16.mxu1 %v2078_v23  ;;  %v2130_v23 = vld [vmem:[%s2638_s1 + $0x3e0] sm:$0xff]  }
  0x43   :  { %1335 = vmatmul.mubr.bf16.vlgmr.msra.gmra.mxu0 %v1618_v17  ;;  %v36_v17 = vld [vmem:[%s2639_s0 + $0xa8] sm:$0x11] }
  0x44   :  { %1383 = vmatmul.mubr.bf16.vlgmr.msra.gmra.mxu1 %v1620_v20  ;;  %1898 = vmatpush3.bf16.msra.mxu0 %v2079_v24  ;;  %v1641_v18 = vcombine.high %v36_v17, %v36_v17  ;;  %v1640_v20 = vcombine.low %v36_v17, %v36_v17  ;;  %v2131_v24 = vld [vmem:[%s2638_s1 + $0x320] sm:$0xff]  }
  0x45   :  { %1926 = vmatpush3.bf16.msra.mxu1 %v2080_v25  ;;  %1899 = vmatprep.subr.bf16.mxu0 %v2081_v26  ;;  %v2132_v25 = vld [vmem:[%s2638_s1 + $0x3a0] sm:$0xff]   ;;  %v2133_v26 = vld [vmem:[%s2638_s1 + $0x358] sm:$0xff]  }
  0x46   :  { %1927 = vmatprep.subr.bf16.mxu1 %v2082_v27  ;;  %1342 = vmatprep.mubr.bf16.mxu0 %v1635_v31  ;;  %v2134_v27 = vld [vmem:[%s2638_s1 + $0x3d8] sm:$0xff]   ;;  %v2138_v31 = vld [vmem:[%s2638_s1 + $0x3d0] sm:$0xff]  }
  0x47   :  { %1390 = vmatprep.mubr.bf16.mxu1 %v1637_v36  ;;  %v2143_v36 = vld [vmem:[%s2638_s1 + $0x308] sm:$0xff]  }
  0x48   :  { %1900 = vmatpush3.bf16.msra.mxu0 %v2083_v28  ;;  %v2135_v28 = vld [vmem:[%s2638_s1 + $0x318] sm:$0xff]  }
  0x49   :  { %1928 = vmatpush3.bf16.msra.mxu1 %v2084_v29  ;;  %1901 = vmatprep.subr.bf16.mxu0 %v2087_v33  ;;  %v2136_v29 = vld [vmem:[%s2638_s1 + $0x398] sm:$0xff]   ;;  %v2140_v33 = vld [vmem:[%s2638_s1 + $0x390] sm:$0xff]  }
  0x4a   :  { %1929 = vmatprep.subr.bf16.mxu1 %v2088_v34  ;;  %v2141_v34 = vld [vmem:[%s2638_s1 + $0x348] sm:$0xff]  }
  0x4b   :  { %1343 = vmatmul.mubr.bf16.gmra.mxu0 %v1634_v32  ;;  %v2139_v32 = vld [vmem:[%s2638_s1 + $0x310] sm:$0xff]  }
  0x4c   :  { %1902 = vmatpush3.bf16.msra.mxu0 %v2090_v37  ;;  %1391 = vmatmul.mubr.bf16.gmra.mxu1 %v1636_v38  ;;  %v2144_v37 = vld [vmem:[%s2638_s1 + $0x388] sm:$0xff]   ;;  %v2145_v38 = vld [vmem:[%s2638_s1 + $0x340] sm:$0xff]  }
  0x4d   :  { %1930 = vmatpush3.bf16.msra.mxu1 %v2091_v39  ;;  %1903 = vmatprep.subr.bf16.mxu0 %v2093_v40  ;;  %v2146_v39 = vld [vmem:[%s2638_s1 + $0x3c0] sm:$0xff]  }
  0x4e   :  { %1931 = vmatprep.subr.bf16.mxu1 %v2094_v41  ;;  %1430 = vmatprep.mubr.bf16.mxu0 %v1623_v0  ;;  %v2147_v40 = vld [vmem:[%s2638_s1 + $0x300] sm:$0xff]  }
  0x4f   :  { %1478 = vmatprep.mubr.bf16.mxu1 %v1625_v3  ;;  %v2148_v41 = vld [vmem:[%s2638_s1 + $0x380] sm:$0xff]  }
  0x50   :  { %1904 = vmatpush3.bf16.msra.mxu0 %v2095_v42  ;;  %v21_v42 = vld [vmem:[%s2639_s0 + $0x30] sm:$0xff] }
  0x51   :  { %1932 = vmatpush3.bf16.msra.mxu1 %v2096_v43  ;;  %1905 = vmatprep.subr.bf16.mxu0 %v2097_v44  ;;  %v29_v43 = vld [vmem:[%s2639_s0 + $0x70] sm:$0xff]  ;;  %v22_v44 = vld [vmem:[%s2639_s0 + $0x38] sm:$0xff] }
  0x52   :  { %1933 = vmatprep.subr.bf16.mxu1 %v2098_v45  ;;  %v1626_v45 = vcombine.low %v21_v42, %v29_v43 }
  0x54   :  { %1906 = vmatpush3.bf16.msra.mxu0 %v2099_v46  ;;  %v1627_v46 = vcombine.high %v21_v42, %v29_v43 }
  0x55   :  { %1934 = vmatpush3.bf16.msra.mxu1 %v2100_v47  ;;  %1907 = vmatprep.subr.bf16.mxu0 %v2101_v48  ;;  %v30_v47 = vld [vmem:[%s2639_s0 + $0x78] sm:$0xff]  ;;  %v37_v48 = vld [vmem:[%s2639_s0 + $0xb0] sm:$0x11] }
  0x56   :  { %1935 = vmatprep.subr.bf16.mxu1 %v2102_v49  ;;  %v38_v49 = vld [vmem:[%s2639_s0 + $0xb8] sm:$0x11] }
  0x58   :  { %1908 = vmatpush3.bf16.msra.mxu0 %v2103_v50  ;;  %v1628_v50 = vcombine.low %v22_v44, %v30_v47 }
  0x59   :  { %1936 = vmatpush3.bf16.msra.mxu1 %v2104_v51  ;;  %1909 = vmatprep.subr.bf16.mxu0 %v2105_v52  ;;  %v1629_v51 = vcombine.high %v22_v44, %v30_v47  ;;  %v1643_v52 = vcombine.high %v37_v48, %v37_v48 }
  0x5a   :  { %1937 = vmatprep.subr.bf16.mxu1 %v2106_v53  ;;  %v1645_v53 = vcombine.high %v38_v49, %v38_v49 }
  0x5c   :  { %1910 = vmatpush3.bf16.msra.mxu0 %v2107_v54  ;;  %v1642_v54 = vcombine.low %v37_v48, %v37_v48 }
  0x5d   :  { %1938 = vmatpush3.bf16.msra.mxu1 %v2108_v55  ;;  %1911 = vmatprep.subr.bf16.mxu0 %v2109_v56  ;;  %v1644_v55 = vcombine.low %v38_v49, %v38_v49 }
  0x5e   :  { %1939 = vmatprep.subr.bf16.mxu1 %v2110_v57 }
  0x60   :  { %1912 = vmatpush3.bf16.msra.mxu0 %v2111_v58  ;;  %v1613_v58 = vld [vmem:[%s2640_s2] ss:$0 sm:$0xff] }
  0x61   :  { %1940 = vmatpush3.bf16.msra.mxu1 %v2112_v59  ;;  %1953 = vmatprep.subr.bf16.mxu0 %v2113_v4 }
  0x62   :  { %1981 = vmatprep.subr.bf16.mxu1 %v2114_v5 }
  0x63   :  { %1431 = vmatmul.mubr.bf16.vlgmr.msra.gmra.mxu0 %v1622_v63 }
  0x64   :  { %1479 = vmatmul.mubr.bf16.vlgmr.msra.gmra.mxu1 %v1624_v2  ;;  %1954 = vmatpush3.bf16.msra.mxu0 %v2115_v6 }
  0x65   :  { %1982 = vmatpush3.bf16.msra.mxu1 %v2116_v7  ;;  %1955 = vmatprep.subr.bf16.mxu0 %v2117_v8 }
  0x66   :  { %1983 = vmatprep.subr.bf16.mxu1 %v2118_v9  ;;  %1438 = vmatprep.mubr.bf16.mxu0 %v1639_v13 }
  0x67   :  { %1486 = vmatprep.mubr.bf16.mxu1 %v1641_v18 }
  0x68   :  { %1956 = vmatpush3.bf16.msra.mxu0 %v2119_v10 }
  0x69   :  { %1984 = vmatpush3.bf16.msra.mxu1 %v2120_v11  ;;  %1957 = vmatprep.subr.bf16.mxu0 %v2123_v15 }
  0x6a   :  { %1985 = vmatprep.subr.bf16.mxu1 %v2124_v16 }
  0x6b   :  { %1439 = vmatmul.mubr.bf16.gmra.mxu0 %v1638_v14 }
  0x6c   :  { %1958 = vmatpush3.bf16.msra.mxu0 %v2126_v19  ;;  %1487 = vmatmul.mubr.bf16.gmra.mxu1 %v1640_v20 }
  0x6d   :  { %1986 = vmatpush3.bf16.msra.mxu1 %v2127_v21  ;;  %1959 = vmatprep.subr.bf16.mxu0 %v2129_v22 }
  0x6e   :  { %1987 = vmatprep.subr.bf16.mxu1 %v2130_v23  ;;  %1526 = vmatprep.mubr.bf16.mxu0 %v1627_v46 }
  0x6f   :  { %1574 = vmatprep.mubr.bf16.mxu1 %v1629_v51 }
  0x70   :  { %1960 = vmatpush3.bf16.msra.mxu0 %v2131_v24 }
  0x71   :  { %1988 = vmatpush3.bf16.msra.mxu1 %v2132_v25  ;;  %1961 = vmatprep.subr.bf16.mxu0 %v2133_v26 }
  0x72   :  { %1989 = vmatprep.subr.bf16.mxu1 %v2134_v27 }
  0x74   :  { %1962 = vmatpush3.bf16.msra.mxu0 %v2135_v28 }
  0x75   :  { %1990 = vmatpush3.bf16.msra.mxu1 %v2136_v29  ;;  %1963 = vmatprep.subr.bf16.mxu0 %v2137_v30 }
  0x76   :  { %1991 = vmatprep.subr.bf16.mxu1 %v2138_v31 }
  0x78   :  { %1964 = vmatpush3.bf16.msra.mxu0 %v2139_v32 }
  0x79   :  { %1992 = vmatpush3.bf16.msra.mxu1 %v2140_v33  ;;  %1965 = vmatprep.subr.bf16.mxu0 %v2141_v34 }
  0x7a   :  { %1993 = vmatprep.subr.bf16.mxu1 %v2142_v35 }
  0x7c   :  { %1966 = vmatpush3.bf16.msra.mxu0 %v2143_v36 }
  0x7d   :  { %1994 = vmatpush3.bf16.msra.mxu1 %v2144_v37  ;;  %1967 = vmatprep.subr.bf16.mxu0 %v2145_v38 }
  0x7e   :  { %1995 = vmatprep.subr.bf16.mxu1 %v2146_v39 }
  0x80   :  { %1968 = vmatpush3.bf16.msra.mxu0 %v2147_v40 }
  0x81   :  { %1996 = vmatpush3.bf16.msra.mxu1 %v2148_v41 }
  0x83   :  { %1527 = vmatmul.mubr.bf16.vlgmr.msra.gmra.mxu0 %v1626_v45 }
  0x84   :  { %1575 = vmatmul.mubr.bf16.vlgmr.msra.gmra.mxu1 %v1628_v50  ;;  %1534 = vmatprep.mubr.bf16.mxu0 %v1643_v52 }
  0x85   :  { %1582 = vmatprep.mubr.bf16.mxu1 %v1645_v53 }
  0x8b   :  { %1535 = vmatmul.mubr.bf16.gmra.mxu0 %v1642_v54 }
  0x8c   :  { %1583 = vmatmul.mubr.bf16.gmra.mxu1 %v1644_v55 }
  0xe3   :  { %v1801_v56 = vpop.f32.mrf.mxu0 }
  0xe4   :  { %v1829_v57 = vpop.f32.mrf.mxu1 }
  0xe5   :  { %v1802_v59 = vpop.f32.mrf.mxu0 }
  0xe6   :  { %v1803_v60 = vadd.f32 %v1802_v59, %v1801_v56  ;;  %v1830_v61 = vpop.f32.mrf.mxu1 }
  0xe7   :  { %v1831_v62 = vadd.f32 %v1830_v61, %v1829_v57  ;;  %v1804_v63 = vpop.f32.mrf.mxu0 }
  0xe8   :  { %v1241_v0 = vadd.f32 %v1803_v60, %v1613_v58  ;;  %v1832_v1 = vpop.f32.mrf.mxu1 }
  0xe9   :  { %v1805_v2 = vpop.f32.mrf.mxu0 }
  0xea   :  { %v1289_v3 = vadd.f32 %v1831_v62, %v1241_v0  ;;  %v1806_v4 = vadd.f32 %v1805_v2, %v1804_v63  ;;  %v1833_v5 = vpop.f32.mrf.mxu1 }
  0xeb   :  { %v1834_v6 = vadd.f32 %v1833_v5, %v1832_v1  ;;  %v1807_v9 = vpop.f32.mrf.mxu0 }
  0xec   :  { %v1244_v7 = vadd.f32 %v1806_v4, %v1613_v58  ;;  %v1835_v10 = vpop.f32.mrf.mxu1 }
  0xed   :  { %v1808_v11 = vpop.f32.mrf.mxu0 }
  0xee   :  { %v1292_v8 = vadd.f32 %v1834_v6, %v1244_v7  ;;  %v1809_v12 = vadd.f32 %v1808_v11, %v1807_v9  ;;  %v1836_v13 = vpop.f32.mrf.mxu1 }
  0xef   :  { %v1810_v14 = vpop.f32.mrf.mxu0  ;;  %v1837_v15 = vadd.f32 %v1836_v13, %v1835_v10 }
  0xf0   :  { %v1249_v16 = vadd.f32 %v1809_v12, %v1613_v58  ;;  %v1838_v17 = vpop.f32.mrf.mxu1 }
  0xf1   :  { %v1811_v18 = vpop.f32.mrf.mxu0 }
  0xf2   :  { %v1297_v19 = vadd.f32 %v1837_v15, %v1249_v16  ;;  %v1839_v20 = vpop.f32.mrf.mxu1 }
 0x103   :  { %v1857_v21 = vpop.f32.mrf.mxu0 }
 0x104   :  { %v1885_v22 = vpop.f32.mrf.mxu1 }
 0x105   :  { %v1858_v23 = vpop.f32.mrf.mxu0 }
 0x106   :  { %v1859_v24 = vadd.f32 %v1858_v23, %v1857_v21  ;;  %v1886_v25 = vpop.f32.mrf.mxu1 }
 0x107   :  { %v1887_v26 = vadd.f32 %v1886_v25, %v1885_v22  ;;  %v1860_v27 = vpop.f32.mrf.mxu0 }
 0x108   :  { %v1337_v28 = vadd.f32 %v1859_v24, %v1289_v3  ;;  %v1888_v29 = vpop.f32.mrf.mxu1 }
 0x109   :  { %v1861_v30 = vpop.f32.mrf.mxu0 }
 0x10a   :  { %v1385_v31 = vadd.f32 %v1887_v26, %v1337_v28  ;;  %v1889_v33 = vpop.f32.mrf.mxu1  ;;  %v1862_v57 = vadd.f32 %v1861_v30, %v1860_v27 }
 0x10b   :  { %v1863_v32 = vpop.f32.mrf.mxu0  ;;  %v1890_v61 = vadd.f32 %v1889_v33, %v1888_v29 }
 0x10c   :  { %v1891_v35 = vpop.f32.mrf.mxu1  ;;  %v1340_v59 = vadd.f32 %v1862_v57, %v1292_v8 }
 0x10d   :  { %v1864_v34 = vpop.f32.mrf.mxu0 }
 0x10e   :  { %v1892_v37 = vpop.f32.mrf.mxu1  ;;  %v1865_v60 = vadd.f32 %v1864_v34, %v1863_v32  ;;  %v1388_v1 = vadd.f32 %v1890_v61, %v1340_v59 }
 0x10f   :  { %v1866_v36 = vpop.f32.mrf.mxu0  ;;  %v1893_v4 = vadd.f32 %v1892_v37, %v1891_v35 }
 0x110   :  { %v1894_v39 = vpop.f32.mrf.mxu1  ;;  %v1345_v3 = vadd.f32 %v1865_v60, %v1297_v19 }
 0x111   :  { %v1867_v38 = vpop.f32.mrf.mxu0 }
 0x112   :  { %v1895_v40 = vpop.f32.mrf.mxu1  ;;  %v1393_v15 = vadd.f32 %v1893_v4, %v1345_v3 }
 0x123   :  { %v1913_v41 = vpop.f32.mrf.mxu0 }
 0x124   :  { %v1941_v42 = vpop.f32.mrf.mxu1 }
 0x125   :  { %v1914_v43 = vpop.f32.mrf.mxu0 }
 0x126   :  { %v1942_v44 = vpop.f32.mrf.mxu1  ;;  %v1915_v58 = vadd.f32 %v1914_v43, %v1913_v41 }
 0x127   :  { %v1916_v45 = vpop.f32.mrf.mxu0  ;;  %v1943_v0 = vadd.f32 %v1942_v44, %v1941_v42 }
 0x128   :  { %v1944_v46 = vpop.f32.mrf.mxu1  ;;  %v1433_v63 = vadd.f32 %v1915_v58, %v1385_v31 }
 0x129   :  { %v1917_v47 = vpop.f32.mrf.mxu0 }
 0x12a   :  { %v1945_v49 = vpop.f32.mrf.mxu1  ;;  %v1918_v62 = vadd.f32 %v1917_v47, %v1916_v45  ;;  %v1481_v9 = vadd.f32 %v1943_v0, %v1433_v63 }
 0x12b   :  { %v1919_v48 = vpop.f32.mrf.mxu0  ;;  %v1946_v13 = vadd.f32 %v1945_v49, %v1944_v46 }
 0x12c   :  { %v1947_v51 = vpop.f32.mrf.mxu1  ;;  %v1436_v6 = vadd.f32 %v1918_v62, %v1388_v1 }
 0x12d   :  { %v1920_v50 = vpop.f32.mrf.mxu0 }
 0x12e   :  { %v1948_v53 = vpop.f32.mrf.mxu1  ;;  %v1921_v10 = vadd.f32 %v1920_v50, %v1919_v48  ;;  %v1484_v17 = vadd.f32 %v1946_v13, %v1436_v6 }
 0x12f   :  { %v1922_v52 = vpop.f32.mrf.mxu0  ;;  %v1949_v21 = vadd.f32 %v1948_v53, %v1947_v51 }
 0x130   :  { %v1950_v55 = vpop.f32.mrf.mxu1  ;;  %v1441_v20 = vadd.f32 %v1921_v10, %v1393_v15 }
 0x131   :  { %v1923_v54 = vpop.f32.mrf.mxu0 }
 0x132   :  { %v1951_v56 = vpop.f32.mrf.mxu1  ;;  %v1489_v30 = vadd.f32 %v1949_v21, %v1441_v20 }
 0x143   :  { %v1969_v2 = vpop.f32.mrf.mxu0 }
 0x144   :  { %v1997_v5 = vpop.f32.mrf.mxu1 }
 0x145   :  { %v1970_v7 = vpop.f32.mrf.mxu0 }
 0x146   :  { %v1971_v11 = vadd.f32 %v1970_v7, %v1969_v2  ;;  %v1998_v12 = vpop.f32.mrf.mxu1 }
 0x147   :  { %v1972_v14 = vpop.f32.mrf.mxu0  ;;  %v1999_v22 = vadd.f32 %v1998_v12, %v1997_v5 }
 0x148   :  { %v1529_v8 = vadd.f32 %v1971_v11, %v1481_v9  ;;  %v2000_v16 = vpop.f32.mrf.mxu1 }
 0x149   :  { %v1973_v18 = vpop.f32.mrf.mxu0 }
 0x14a   :  { %v1974_v23 = vadd.f32 %v1973_v18, %v1972_v14  ;;  %v2001_v19 = vpop.f32.mrf.mxu1  ;;  %v1577_v25 = vadd.f32 %v1999_v22, %v1529_v8 }
 0x14b   :  { %v1975_v24 = vpop.f32.mrf.mxu0  ;;  %v2002_v27 = vadd.f32 %v2001_v19, %v2000_v16 }
 0x14c   :  { %v1532_v26 = vadd.f32 %v1974_v23, %v1484_v17  ;;  %v2003_v28 = vpop.f32.mrf.mxu1  ;;  %v1590_v35 = vmax.f32 %v1577_v25, 0.0 }
 0x14d   :  { %v1976_v29 = vpop.f32.mrf.mxu0 }
 0x14e   :  { %v1580_v31 = vadd.f32 %v2002_v27, %v1532_v26  ;;  %v1977_v32 = vadd.f32 %v1976_v29, %v1975_v24  ;;  %v2004_v33 = vpop.f32.mrf.mxu1 }
 0x14f   :  { %v1978_v34 = vpop.f32.mrf.mxu0  ;;  %v2005_v38 = vadd.f32 %v2004_v33, %v2003_v28 }
 0x150   :  { %v1591_v36 = vmax.f32 %v1580_v31, 0.0  ;;  %v1537_v37 = vadd.f32 %v1977_v32, %v1489_v30  ;;  %v2006_v39 = vpop.f32.mrf.mxu1 }
 0x151   :  { %v1979_v40 = vpop.f32.mrf.mxu0 }
 0x152   :  { %v1783_v41 = vpack.c.bf16 %v1591_v36, %v1590_v35  ;;  %v1585_v42 = vadd.f32 %v2005_v38, %v1537_v37  ;;  %v2007_v43 = vpop.f32.mrf.mxu1 }
 0x154   :  { %v1592_v44 = vmax.f32 %v1585_v42, 0.0  ;;  %1784 = vst [vmem:[%s2641_s3] sm:$0xff] %v1783_v41  }
 0x156   :  { %v1779_v45 = vpack.c.bf16 %v1592_v44, %v1592_v44 }
 0x158   :  { %1608 = vst [vmem:[%s2641_s3 + $0x8] sm:$0x1] %v1779_v45 }

</bundles_post_ra>
